<compile_context>
chip_gen: v5e
topology: v5e:2x2
jax: 0.10.0
libtpu: 0.0.40
codegen_flags: <defaults>
</compile_context>

<pallas_src>
import jax
import jax.numpy as jnp
from jax.experimental import pallas as pl
from jax.experimental.pallas import tpu as pltpu


def _round_up(x, m):
    return ((x + m - 1) // m) * m


# ----------------------------------------------------------------------------
# Fused kernel: verb MFA + noun MFA + mix + rels(softmax) + recon
# ----------------------------------------------------------------------------
def _arm_fused_kernel(vemb_ref, vmask_ref, nemb_ref, nmask_ref, month_ref,
                      qvT_ref, wov_ref, qnT_ref, won_ref,
                      wmv_ref, wmn_ref, bmix_ref,
                      wrels_ref, brels_ref, wrecon_ref, brecon_ref,
                      recon_ref, rels_ref):
    f32 = jnp.float32

    def mfa(emb, mask, qT, wout_flat):
        # emb: (TS, L, D), mask: (TS, L), qT: (D, H), wout_flat: (H*D, Dout)
        ts, L, D = emb.shape
        H = qT.shape[1]
        # scores for all heads with one MXU matmul: (TS*L, D) @ (D, H)
        scores = jnp.dot(emb.reshape(ts * L, D), qT,
                         preferred_element_type=f32).reshape(ts, L, H)
        scores = jnp.swapaxes(scores, 1, 2)                 # (TS, H, L) lanes=L
        scores = jnp.where(mask[:, None, :] > 0.0, scores, f32(-1e30))
        m = jnp.max(scores, axis=-1, keepdims=True)         # lane reduce
        p = jnp.exp(scores - m)                             # masked -> exactly 0
        denom = jnp.sum(p, axis=-1, keepdims=True)
        attn = p * pl.reciprocal(denom, approx=True)        # EUP slot, free-ish
        # per-span (batched) context matmul on the MXU: (H,L) @ (L,D) per span
        ctx = jnp.einsum("shl,sld->shd", attn, emb,
                         preferred_element_type=f32)        # (TS, H, D)
        # all head output projections fused: K = H*D in one MXU push
        out = jnp.dot(ctx.reshape(ts, H * D), wout_flat,
                      preferred_element_type=f32)           # (TS, Dout)
        return jnp.maximum(out, 0.0)                        # ReLU

    verb = mfa(vemb_ref[...], vmask_ref[...], qvT_ref[...], wov_ref[...])
    noun = mfa(nemb_ref[...], nmask_ref[...], qnT_ref[...], won_ref[...])
    # TODO(synk): month_info_encode=1 of TopicNounMultiHead modelled as an
    # additive learned month embedding (gathered in the wrapper).
    noun = noun + month_ref[...]

    # MixingLayer_Concat: concat([verb, noun, e1, e2]) @ W + b -> ReLU.
    # e1/e2 terms are constant across spans and folded into bmix by the wrapper.
    mix = (jnp.dot(verb, wmv_ref[...], preferred_element_type=jnp.float32)
           + jnp.dot(noun, wmn_ref[...], preferred_element_type=jnp.float32)
           + bmix_ref[...])
    mix = jnp.maximum(mix, 0.0)

    # DistributionLayer: Linear -> softmax over the (lane-padded) desc axis.
    logits = (jnp.dot(mix, wrels_ref[...], preferred_element_type=jnp.float32)
              + brels_ref[...])                              # padded lanes = -1e30
    m = jnp.max(logits, axis=-1, keepdims=True)
    p = jnp.exp(logits - m)
    rels = p / jnp.sum(p, axis=-1, keepdims=True)            # (TS, NP)
    rels_ref[...] = rels

    # l_recon: Linear(num_descs -> d_word), lane-padded output.
    recon_ref[...] = (jnp.dot(rels, wrecon_ref[...],
                              preferred_element_type=jnp.float32)
                      + brecon_ref[...])


def _arm_pallas(v_emb, v_mask, n_emb, n_mask, month_feat,
                qvT, wov_flat, qnT, won_flat,
                w_mix_v, w_mix_n, bias_mix,
                w_rels_pad, b_rels_pad, w_recon_pad, b_recon_pad, *, ts):
    S, L, D = v_emb.shape
    d_nh = month_feat.shape[-1]
    NP = w_rels_pad.shape[-1]
    DWP = w_recon_pad.shape[-1]
    grid = (S // ts,)

    span3 = lambda i: (i, 0, 0)
    span2 = lambda i: (i, 0)
    pin2 = lambda i: (0, 0)

    weights = (qvT, wov_flat, qnT, won_flat, w_mix_v, w_mix_n, bias_mix,
               w_rels_pad, b_rels_pad, w_recon_pad, b_recon_pad)
    in_specs = [
        pl.BlockSpec((ts, L, D), span3),      # v_emb   (tiled over spans)
        pl.BlockSpec((ts, L), span2),         # v_mask
        pl.BlockSpec((ts, L, D), span3),      # n_emb
        pl.BlockSpec((ts, L), span2),         # n_mask
        pl.BlockSpec((ts, d_nh), span2),      # month features
    ] + [pl.BlockSpec(w.shape, pin2) for w in weights]   # pinned weights

    out_specs = (pl.BlockSpec((ts, DWP), span2),
                 pl.BlockSpec((ts, NP), span2))

    return pl.pallas_call(
        _arm_fused_kernel,
        grid=grid,
        in_specs=in_specs,
        out_specs=out_specs,
        out_shape=(jax.ShapeDtypeStruct((S, DWP), jnp.float32),
                   jax.ShapeDtypeStruct((S, NP), jnp.float32)),
        compiler_params=pltpu.CompilerParams(
            dimension_semantics=("parallel",)),
    )(v_emb, v_mask, n_emb, n_mask, month_feat, *weights)


# ----------------------------------------------------------------------------
# Parameter construction (deterministic, in-script).
# ----------------------------------------------------------------------------
def init_arm_params(key, *, num_heads, d_word, d_topic, d_noun_hidden,
                    d_char, d_mix, num_descs, num_chars, vocab_size):
    ks = jax.random.split(key, 16)
    n = lambda k, shape, s=0.1: (s * jax.random.normal(k, shape)).astype(jnp.float32)
    return {
        "We":        n(ks[0], (vocab_size, d_word)),            # tensor_We
        "E_char":    n(ks[1], (num_chars, d_char)),             # l_ent
        "Wq_verb":   n(ks[2], (num_heads, d_topic, d_word)),    # verb MFA query
        "Wout_verb": n(ks[3], (num_heads, d_word, d_topic)),    # verb MFA out proj
        "Wq_noun":   n(ks[4], (num_heads, d_topic, d_word)),    # noun MFA query
        "Wout_noun": n(ks[5], (num_heads, d_word, d_noun_hidden)),
        "E_month":   n(ks[6], (12, d_noun_hidden)),             # month_info_encode=1
        "w_mix_v":   n(ks[7], (d_topic, d_mix)),
        "w_mix_n":   n(ks[8], (d_noun_hidden, d_mix)),
        "w_mix_e1":  n(ks[9], (d_char, d_mix)),
        "w_mix_e2":  n(ks[10], (d_char, d_mix)),
        "b_mix":     jnp.zeros((1, d_mix), jnp.float32),
        "w_rels":    n(ks[11], (d_mix, num_descs)),
        "b_rels":    jnp.zeros((1, num_descs), jnp.float32),
        "w_recon":   n(ks[12], (num_descs, d_word)),            # l_recon
        "b_recon":   jnp.zeros((1, d_word), jnp.float32),
    }


# ----------------------------------------------------------------------------
# ARM.forward equivalent.
#   spans, verb_spans, noun_spans : (S, L) int32 word ids, -1 = padding
#   topic_emb : (d_topic,) ; e1, e2 : scalar char ids ; months : (S,) int32
# Returns (outputs, outputs_l_rels)  ==  ((S, d_word), (S, num_descs))
# ----------------------------------------------------------------------------
@jax.jit
def arm_forward(params, spans, verb_spans, noun_spans, topic_emb, e1, e2, months):
    We = params["We"]
    S = spans.shape[0]
    d_word = We.shape[-1]
    num_descs = params["w_rels"].shape[-1]
    H, d_topic, _ = params["Wq_verb"].shape
    d_nh = params["Wout_noun"].shape[-1]
    topic = topic_emb.astype(jnp.float32)

    # TODO(synk): at production vocab/S sizes, move this gather into the kernel
    # (scalar-prefetched span ids + DMA gather of We rows from HBM) instead of
    # materialising (S, L, d_word) in HBM and re-reading it.
    def span_embed(ids):
        mask = (ids >= 0).astype(jnp.float32)                   # (S, L)
        safe = jnp.clip(ids, 0, We.shape[0] - 1)
        return jnp.take(We, safe, axis=0), mask                 # (S, L, d_word)

    v_emb, v_mask = span_embed(verb_spans)
    n_emb, n_mask = span_embed(noun_spans)

    # topic -> per-head queries (tiny projections, done in f32 glue), stored
    # pre-transposed as (D, H) so the kernel needs no transpose.
    qvT = jnp.einsum("t,htd->dh", topic, params["Wq_verb"])     # (d_word, H)
    qnT = jnp.einsum("t,htd->dh", topic, params["Wq_noun"])     # (d_word, H)
    wov_flat = params["Wout_verb"].reshape(H * d_word, d_topic)
    won_flat = params["Wout_noun"].reshape(H * d_word, d_nh)

    month_feat = jnp.take(params["E_month"], months, axis=0)    # (S, d_nh)

    # Fold the span-independent entity terms (l_ent(e1/e2).expand @ W) into one
    # bias row — mathematically identical to the concat-mixing layer.
    e1f = params["E_char"][e1]
    e2f = params["E_char"][e2]
    bias_mix = (params["b_mix"]
                + (e1f @ params["w_mix_e1"])[None, :]
                + (e2f @ params["w_mix_e2"])[None, :])          # (1, d_mix)

    # Lane-pad the stored outputs to 128 lanes (dense vst). Padded rels logits
    # get a -1e30 bias so the softmax over 128 lanes equals the real softmax.
    NP = _round_up(num_descs, 128)
    DWP = _round_up(d_word, 128)
    w_rels_pad = jnp.zeros((params["w_rels"].shape[0], NP), jnp.float32
                           ).at[:, :num_descs].set(params["w_rels"])
    b_rels_pad = jnp.full((1, NP), -1e30, jnp.float32
                          ).at[:, :num_descs].set(params["b_rels"])
    w_recon_pad = jnp.zeros((NP, DWP), jnp.float32
                            ).at[:num_descs, :d_word].set(params["w_recon"])
    b_recon_pad = jnp.zeros((1, DWP), jnp.float32
                            ).at[:, :d_word].set(params["b_recon"])

    # Grid over spans: tile is a multiple of 8 sublanes, modest size so
    # double-buffered tiles fit the default scoped VMEM on v5e/v6e/v7x.
    ts = min(128, _round_up(S, 8))
    S_pad = _round_up(S, ts)
    pad = S_pad - S
    if pad:
        v_emb = jnp.pad(v_emb, ((0, pad), (0, 0), (0, 0)))
        n_emb = jnp.pad(n_emb, ((0, pad), (0, 0), (0, 0)))
        v_mask = jnp.pad(v_mask, ((0, pad), (0, 0)))
        n_mask = jnp.pad(n_mask, ((0, pad), (0, 0)))
        month_feat = jnp.pad(month_feat, ((0, pad), (0, 0)))

    recon_pad, rels_pad = _arm_pallas(
        v_emb, v_mask, n_emb, n_mask, month_feat,
        qvT, wov_flat, qnT, won_flat,
        params["w_mix_v"], params["w_mix_n"], bias_mix,
        w_rels_pad, b_rels_pad, w_recon_pad, b_recon_pad, ts=ts)

    return recon_pad[:S, :d_word], rels_pad[:S, :num_descs]


if __name__ == "__main__":
    # Small deterministic shapes
    num_heads, d_word, d_topic = 2, 32, 16
    d_noun_hidden, d_char, d_book, d_mix = 16, 8, 8, 32
    num_descs, num_chars, vocab_size = 16, 10, 50
    S, L = 8, 8

    key = jax.random.PRNGKey(0)
    k_par, k_sp, k_vs, k_ns, k_top, k_mo, k_pad = jax.random.split(key, 7)

    params = init_arm_params(
        k_par, num_heads=num_heads, d_word=d_word, d_topic=d_topic,
        d_noun_hidden=d_noun_hidden, d_char=d_char, d_mix=d_mix,
        num_descs=num_descs, num_chars=num_chars, vocab_size=vocab_size)

    def make_spans(k):
        ids = jax.random.randint(k, (S, L), 0, vocab_size, dtype=jnp.int32)
        # pad out the tail of each span (keep at least the first word valid)
        lens = jax.random.randint(k_pad, (S,), 1, L + 1, dtype=jnp.int32)
        pos = jnp.arange(L, dtype=jnp.int32)[None, :]
        return jnp.where(pos < lens[:, None], ids, -1)

    spans = make_spans(k_sp)
    verb_spans = make_spans(k_vs)
    noun_spans = make_spans(k_ns)
    topic_emb = jax.random.normal(k_top, (d_topic,), dtype=jnp.float32)
    months = jax.random.randint(k_mo, (S,), 0, 12, dtype=jnp.int32)
    e1 = jnp.int32(1)
    e2 = jnp.int32(2)

    outputs, rels = arm_forward(params, spans, verb_spans, noun_spans,
                                topic_emb, e1, e2, months)
    jax.block_until_ready((outputs, rels))

    assert outputs.shape == (S, d_word)
    assert rels.shape == (S, num_descs)
    # DistributionLayer output must be a valid distribution over num_descs
    assert bool(jnp.allclose(jnp.sum(rels, axis=-1), 1.0, atol=1e-4))
    print("KERNEL_OK")
</pallas_src>

<mosaic_0001>
module attributes {stable_mosaic.version = 11 : i64} {
  func.func @_arm_fused_kernel(%arg0: i32, %arg1: memref<8x8x32xf32, #tpu.memory_space<vmem>>, %arg2: memref<8x8xf32, #tpu.memory_space<vmem>>, %arg3: memref<8x8x32xf32, #tpu.memory_space<vmem>>, %arg4: memref<8x8xf32, #tpu.memory_space<vmem>>, %arg5: memref<8x16xf32, #tpu.memory_space<vmem>>, %arg6: memref<32x2xf32, #tpu.memory_space<vmem>>, %arg7: memref<64x16xf32, #tpu.memory_space<vmem>>, %arg8: memref<32x2xf32, #tpu.memory_space<vmem>>, %arg9: memref<64x16xf32, #tpu.memory_space<vmem>>, %arg10: memref<16x32xf32, #tpu.memory_space<vmem>>, %arg11: memref<16x32xf32, #tpu.memory_space<vmem>>, %arg12: memref<1x32xf32, #tpu.memory_space<vmem>>, %arg13: memref<32x128xf32, #tpu.memory_space<vmem>>, %arg14: memref<1x128xf32, #tpu.memory_space<vmem>>, %arg15: memref<128x128xf32, #tpu.memory_space<vmem>>, %arg16: memref<1x128xf32, #tpu.memory_space<vmem>>, %arg17: memref<8x128xf32, #tpu.memory_space<vmem>>, %arg18: memref<8x128xf32, #tpu.memory_space<vmem>>) attributes {dimension_semantics = [#tpu.dimension_semantics<parallel>], iteration_bounds = array<i64: 1>, scalar_prefetch = 0 : i64, scratch_operands = 0 : i64, tpu.core_type = #tpu.core_type<tc>, window_params = [{transform_indices = @transform_0, window_bounds = array<i64: 8, 8, 32>}, {transform_indices = @transform_1, window_bounds = array<i64: 8, 8>}, {transform_indices = @transform_2, window_bounds = array<i64: 8, 8, 32>}, {transform_indices = @transform_3, window_bounds = array<i64: 8, 8>}, {transform_indices = @transform_4, window_bounds = array<i64: 8, 16>}, {pipeline_mode = #tpu.pipeline_mode<synchronous>, transform_indices = @transform_5, window_bounds = array<i64: 32, 2>}, {pipeline_mode = #tpu.pipeline_mode<synchronous>, transform_indices = @transform_6, window_bounds = array<i64: 64, 16>}, {pipeline_mode = #tpu.pipeline_mode<synchronous>, transform_indices = @transform_7, window_bounds = array<i64: 32, 2>}, {pipeline_mode = #tpu.pipeline_mode<synchronous>, transform_indices = @transform_8, window_bounds = array<i64: 64, 16>}, {pipeline_mode = #tpu.pipeline_mode<synchronous>, transform_indices = @transform_9, window_bounds = array<i64: 16, 32>}, {pipeline_mode = #tpu.pipeline_mode<synchronous>, transform_indices = @transform_10, window_bounds = array<i64: 16, 32>}, {pipeline_mode = #tpu.pipeline_mode<synchronous>, transform_indices = @transform_11, window_bounds = array<i64: 1, 32>}, {pipeline_mode = #tpu.pipeline_mode<synchronous>, transform_indices = @transform_12, window_bounds = array<i64: 32, 128>}, {pipeline_mode = #tpu.pipeline_mode<synchronous>, transform_indices = @transform_13, window_bounds = array<i64: 1, 128>}, {pipeline_mode = #tpu.pipeline_mode<synchronous>, transform_indices = @transform_14, window_bounds = array<i64: 128, 128>}, {pipeline_mode = #tpu.pipeline_mode<synchronous>, transform_indices = @transform_15, window_bounds = array<i64: 1, 128>}, {transform_indices = @transform_16, window_bounds = array<i64: 8, 128>}, {transform_indices = @transform_17, window_bounds = array<i64: 8, 128>}]} {
    %c0 = arith.constant 0 : index
    %c0_0 = arith.constant 0 : index
    %c0_1 = arith.constant 0 : index
    %0 = vector.load %arg1[%c0, %c0_0, %c0_1] : memref<8x8x32xf32, #tpu.memory_space<vmem>>, vector<8x8x32xf32>
    %c0_2 = arith.constant 0 : index
    %c0_3 = arith.constant 0 : index
    %1 = vector.load %arg2[%c0_2, %c0_3] : memref<8x8xf32, #tpu.memory_space<vmem>>, vector<8x8xf32>
    %c0_4 = arith.constant 0 : index
    %c0_5 = arith.constant 0 : index
    %2 = vector.load %arg6[%c0_4, %c0_5] : memref<32x2xf32, #tpu.memory_space<vmem>>, vector<32x2xf32>
    %c0_6 = arith.constant 0 : index
    %c0_7 = arith.constant 0 : index
    %3 = vector.load %arg7[%c0_6, %c0_7] : memref<64x16xf32, #tpu.memory_space<vmem>>, vector<64x16xf32>
    %4 = vector.shape_cast %0 : vector<8x8x32xf32> to vector<64x32xf32>
    %cst = arith.constant dense<0.000000e+00> : vector<64x2xf32>
    %5 = tpu.matmul %4, %2, %cst {dimension_numbers = #tpu.dot_dimension_numbers<[1], [0], [0], [1], [0, 0, 1, 1], [], []>} : vector<64x32xf32>, vector<32x2xf32>, vector<64x2xf32> -> vector<64x2xf32>
    %6 = vector.shape_cast %5 : vector<64x2xf32> to vector<8x8x2xf32>
    %7 = tpu.transpose %6, [0, 2, 1] : vector<8x8x2xf32> -> vector<8x2x8xf32>
    %8 = vector.shape_cast %1 : vector<8x8xf32> to vector<8x1x8xf32>
    %cst_8 = arith.constant 0.000000e+00 : f32
    %9 = vector.broadcast %cst_8 : f32 to vector<8x1x8xf32>
    %10 = arith.cmpf ogt, %8, %9 : vector<8x1x8xf32>
    %cst_9 = arith.constant -1.000000e+30 : f32
    %11 = vector.shape_cast %10 : vector<8x1x8xi1> to vector<8x1x8xi1>
    %12 = vector.broadcast %11 : vector<8x1x8xi1> to vector<8x2x8xi1>
    %13 = vector.broadcast %cst_9 : f32 to vector<8x2x8xf32>
    %14 = arith.select %12, %7, %13 : vector<8x2x8xi1>, vector<8x2x8xf32>
    %cst_10 = arith.constant dense<0xFF800000> : vector<8x2xf32>
    %15 = vector.multi_reduction <maximumf>, %14, %cst_10 [2] : vector<8x2x8xf32> to vector<8x2xf32>
    %16 = vector.shape_cast %15 : vector<8x2xf32> to vector<8x2x1xf32>
    %17 = vector.broadcast %16 : vector<8x2x1xf32> to vector<8x2x8xf32>
    %18 = arith.subf %14, %17 : vector<8x2x8xf32>
    %19 = math.exp %18 : vector<8x2x8xf32>
    %cst_11 = arith.constant dense<0.000000e+00> : vector<8x2xf32>
    %20 = vector.multi_reduction <add>, %19, %cst_11 [2] : vector<8x2x8xf32> to vector<8x2xf32>
    %21 = vector.shape_cast %20 : vector<8x2xf32> to vector<8x2x1xf32>
    %22 = tpu.reciprocal %21 {approx = true} : vector<8x2x1xf32> -> vector<8x2x1xf32>
    %23 = vector.broadcast %22 : vector<8x2x1xf32> to vector<8x2x8xf32>
    %24 = arith.mulf %19, %23 : vector<8x2x8xf32>
    "tpu.trace_start"() <{level = 10 : i32, message = "shl,sld->shd"}> : () -> ()
    %cst_12 = arith.constant dense<0.000000e+00> : vector<8x2x32xf32>
    %25 = tpu.matmul %24, %0, %cst_12 {dimension_numbers = #tpu.dot_dimension_numbers<[2], [1], [1], [2], [0, 0, 0, 1, 1, 2], [0], [0]>} : vector<8x2x8xf32>, vector<8x8x32xf32>, vector<8x2x32xf32> -> vector<8x2x32xf32>
    "tpu.trace_stop"() : () -> ()
    %26 = vector.shape_cast %25 : vector<8x2x32xf32> to vector<8x64xf32>
    %cst_13 = arith.constant dense<0.000000e+00> : vector<8x16xf32>
    %27 = tpu.matmul %26, %3, %cst_13 {dimension_numbers = #tpu.dot_dimension_numbers<[1], [0], [0], [1], [0, 0, 1, 1], [], []>} : vector<8x64xf32>, vector<64x16xf32>, vector<8x16xf32> -> vector<8x16xf32>
    %cst_14 = arith.constant 0.000000e+00 : f32
    %28 = vector.broadcast %cst_14 : f32 to vector<8x16xf32>
    %29 = arith.maximumf %27, %28 : vector<8x16xf32>
    %c0_15 = arith.constant 0 : index
    %c0_16 = arith.constant 0 : index
    %c0_17 = arith.constant 0 : index
    %30 = vector.load %arg3[%c0_15, %c0_16, %c0_17] : memref<8x8x32xf32, #tpu.memory_space<vmem>>, vector<8x8x32xf32>
    %c0_18 = arith.constant 0 : index
    %c0_19 = arith.constant 0 : index
    %31 = vector.load %arg4[%c0_18, %c0_19] : memref<8x8xf32, #tpu.memory_space<vmem>>, vector<8x8xf32>
    %c0_20 = arith.constant 0 : index
    %c0_21 = arith.constant 0 : index
    %32 = vector.load %arg8[%c0_20, %c0_21] : memref<32x2xf32, #tpu.memory_space<vmem>>, vector<32x2xf32>
    %c0_22 = arith.constant 0 : index
    %c0_23 = arith.constant 0 : index
    %33 = vector.load %arg9[%c0_22, %c0_23] : memref<64x16xf32, #tpu.memory_space<vmem>>, vector<64x16xf32>
    %34 = vector.shape_cast %30 : vector<8x8x32xf32> to vector<64x32xf32>
    %cst_24 = arith.constant dense<0.000000e+00> : vector<64x2xf32>
    %35 = tpu.matmul %34, %32, %cst_24 {dimension_numbers = #tpu.dot_dimension_numbers<[1], [0], [0], [1], [0, 0, 1, 1], [], []>} : vector<64x32xf32>, vector<32x2xf32>, vector<64x2xf32> -> vector<64x2xf32>
    %36 = vector.shape_cast %35 : vector<64x2xf32> to vector<8x8x2xf32>
    %37 = tpu.transpose %36, [0, 2, 1] : vector<8x8x2xf32> -> vector<8x2x8xf32>
    %38 = vector.shape_cast %31 : vector<8x8xf32> to vector<8x1x8xf32>
    %cst_25 = arith.constant 0.000000e+00 : f32
    %39 = vector.broadcast %cst_25 : f32 to vector<8x1x8xf32>
    %40 = arith.cmpf ogt, %38, %39 : vector<8x1x8xf32>
    %cst_26 = arith.constant -1.000000e+30 : f32
    %41 = vector.shape_cast %40 : vector<8x1x8xi1> to vector<8x1x8xi1>
    %42 = vector.broadcast %41 : vector<8x1x8xi1> to vector<8x2x8xi1>
    %43 = vector.broadcast %cst_26 : f32 to vector<8x2x8xf32>
    %44 = arith.select %42, %37, %43 : vector<8x2x8xi1>, vector<8x2x8xf32>
    %cst_27 = arith.constant dense<0xFF800000> : vector<8x2xf32>
    %45 = vector.multi_reduction <maximumf>, %44, %cst_27 [2] : vector<8x2x8xf32> to vector<8x2xf32>
    %46 = vector.shape_cast %45 : vector<8x2xf32> to vector<8x2x1xf32>
    %47 = vector.broadcast %46 : vector<8x2x1xf32> to vector<8x2x8xf32>
    %48 = arith.subf %44, %47 : vector<8x2x8xf32>
    %49 = math.exp %48 : vector<8x2x8xf32>
    %cst_28 = arith.constant dense<0.000000e+00> : vector<8x2xf32>
    %50 = vector.multi_reduction <add>, %49, %cst_28 [2] : vector<8x2x8xf32> to vector<8x2xf32>
    %51 = vector.shape_cast %50 : vector<8x2xf32> to vector<8x2x1xf32>
    %52 = tpu.reciprocal %51 {approx = true} : vector<8x2x1xf32> -> vector<8x2x1xf32>
    %53 = vector.broadcast %52 : vector<8x2x1xf32> to vector<8x2x8xf32>
    %54 = arith.mulf %49, %53 : vector<8x2x8xf32>
    "tpu.trace_start"() <{level = 10 : i32, message = "shl,sld->shd"}> : () -> ()
    %cst_29 = arith.constant dense<0.000000e+00> : vector<8x2x32xf32>
    %55 = tpu.matmul %54, %30, %cst_29 {dimension_numbers = #tpu.dot_dimension_numbers<[2], [1], [1], [2], [0, 0, 0, 1, 1, 2], [0], [0]>} : vector<8x2x8xf32>, vector<8x8x32xf32>, vector<8x2x32xf32> -> vector<8x2x32xf32>
    "tpu.trace_stop"() : () -> ()
    %56 = vector.shape_cast %55 : vector<8x2x32xf32> to vector<8x64xf32>
    %cst_30 = arith.constant dense<0.000000e+00> : vector<8x16xf32>
    %57 = tpu.matmul %56, %33, %cst_30 {dimension_numbers = #tpu.dot_dimension_numbers<[1], [0], [0], [1], [0, 0, 1, 1], [], []>} : vector<8x64xf32>, vector<64x16xf32>, vector<8x16xf32> -> vector<8x16xf32>
    %cst_31 = arith.constant 0.000000e+00 : f32
    %58 = vector.broadcast %cst_31 : f32 to vector<8x16xf32>
    %59 = arith.maximumf %57, %58 : vector<8x16xf32>
    %c0_32 = arith.constant 0 : index
    %c0_33 = arith.constant 0 : index
    %60 = vector.load %arg5[%c0_32, %c0_33] : memref<8x16xf32, #tpu.memory_space<vmem>>, vector<8x16xf32>
    %61 = arith.addf %59, %60 : vector<8x16xf32>
    %c0_34 = arith.constant 0 : index
    %c0_35 = arith.constant 0 : index
    %62 = vector.load %arg10[%c0_34, %c0_35] : memref<16x32xf32, #tpu.memory_space<vmem>>, vector<16x32xf32>
    %cst_36 = arith.constant dense<0.000000e+00> : vector<8x32xf32>
    %63 = tpu.matmul %29, %62, %cst_36 {dimension_numbers = #tpu.dot_dimension_numbers<[1], [0], [0], [1], [0, 0, 1, 1], [], []>} : vector<8x16xf32>, vector<16x32xf32>, vector<8x32xf32> -> vector<8x32xf32>
    %c0_37 = arith.constant 0 : index
    %c0_38 = arith.constant 0 : index
    %64 = vector.load %arg11[%c0_37, %c0_38] : memref<16x32xf32, #tpu.memory_space<vmem>>, vector<16x32xf32>
    %cst_39 = arith.constant dense<0.000000e+00> : vector<8x32xf32>
    %65 = tpu.matmul %61, %64, %cst_39 {dimension_numbers = #tpu.dot_dimension_numbers<[1], [0], [0], [1], [0, 0, 1, 1], [], []>} : vector<8x16xf32>, vector<16x32xf32>, vector<8x32xf32> -> vector<8x32xf32>
    %66 = arith.addf %63, %65 : vector<8x32xf32>
    %c0_40 = arith.constant 0 : index
    %c0_41 = arith.constant 0 : index
    %67 = vector.load %arg12[%c0_40, %c0_41] : memref<1x32xf32, #tpu.memory_space<vmem>>, vector<1x32xf32>
    %68 = vector.broadcast %67 : vector<1x32xf32> to vector<8x32xf32>
    %69 = arith.addf %66, %68 : vector<8x32xf32>
    %cst_42 = arith.constant 0.000000e+00 : f32
    %70 = vector.broadcast %cst_42 : f32 to vector<8x32xf32>
    %71 = arith.maximumf %69, %70 : vector<8x32xf32>
    %c0_43 = arith.constant 0 : index
    %c0_44 = arith.constant 0 : index
    %72 = vector.load %arg13[%c0_43, %c0_44] : memref<32x128xf32, #tpu.memory_space<vmem>>, vector<32x128xf32>
    %cst_45 = arith.constant dense<0.000000e+00> : vector<8x128xf32>
    %73 = tpu.matmul %71, %72, %cst_45 {dimension_numbers = #tpu.dot_dimension_numbers<[1], [0], [0], [1], [0, 0, 1, 1], [], []>} : vector<8x32xf32>, vector<32x128xf32>, vector<8x128xf32> -> vector<8x128xf32>
    %c0_46 = arith.constant 0 : index
    %c0_47 = arith.constant 0 : index
    %74 = vector.load %arg14[%c0_46, %c0_47] : memref<1x128xf32, #tpu.memory_space<vmem>>, vector<1x128xf32>
    %75 = vector.broadcast %74 : vector<1x128xf32> to vector<8x128xf32>
    %76 = arith.addf %73, %75 : vector<8x128xf32>
    %cst_48 = arith.constant dense<0xFF800000> : vector<8xf32>
    %77 = vector.multi_reduction <maximumf>, %76, %cst_48 [1] : vector<8x128xf32> to vector<8xf32>
    %78 = vector.shape_cast %77 : vector<8xf32> to vector<8x1xf32>
    %79 = vector.broadcast %78 : vector<8x1xf32> to vector<8x128xf32>
    %80 = arith.subf %76, %79 : vector<8x128xf32>
    %81 = math.exp %80 : vector<8x128xf32>
    %cst_49 = arith.constant dense<0.000000e+00> : vector<8xf32>
    %82 = vector.multi_reduction <add>, %81, %cst_49 [1] : vector<8x128xf32> to vector<8xf32>
    %83 = vector.shape_cast %82 : vector<8xf32> to vector<8x1xf32>
    %84 = vector.broadcast %83 : vector<8x1xf32> to vector<8x128xf32>
    %85 = arith.divf %81, %84 : vector<8x128xf32>
    %c0_50 = arith.constant 0 : index
    %c0_51 = arith.constant 0 : index
    %86 = vector.load %arg18[%c0_50, %c0_51] : memref<8x128xf32, #tpu.memory_space<vmem>>, vector<8x128xf32>
    tpu.vector_store %arg18[%c0_50, %c0_51], %85 {strides = array<i32>} : memref<8x128xf32, #tpu.memory_space<vmem>>, vector<8x128xf32>,
    %c0_52 = arith.constant 0 : index
    %c0_53 = arith.constant 0 : index
    %87 = vector.load %arg15[%c0_52, %c0_53] : memref<128x128xf32, #tpu.memory_space<vmem>>, vector<128x128xf32>
    %cst_54 = arith.constant dense<0.000000e+00> : vector<8x128xf32>
    %88 = tpu.matmul %85, %87, %cst_54 {dimension_numbers = #tpu.dot_dimension_numbers<[1], [0], [0], [1], [0, 0, 1, 1], [], []>} : vector<8x128xf32>, vector<128x128xf32>, vector<8x128xf32> -> vector<8x128xf32>
    %c0_55 = arith.constant 0 : index
    %c0_56 = arith.constant 0 : index
    %89 = vector.load %arg16[%c0_55, %c0_56] : memref<1x128xf32, #tpu.memory_space<vmem>>, vector<1x128xf32>
    %90 = vector.broadcast %89 : vector<1x128xf32> to vector<8x128xf32>
    %91 = arith.addf %88, %90 : vector<8x128xf32>
    %c0_57 = arith.constant 0 : index
    %c0_58 = arith.constant 0 : index
    %92 = vector.load %arg17[%c0_57, %c0_58] : memref<8x128xf32, #tpu.memory_space<vmem>>, vector<8x128xf32>
    tpu.vector_store %arg17[%c0_57, %c0_58], %91 {strides = array<i32>} : memref<8x128xf32, #tpu.memory_space<vmem>>, vector<8x128xf32>,
    return
  }
  func.func @transform_0(%arg0: i32) -> (i32, i32, i32) {
    %c0_i32 = arith.constant 0 : i32
    %c0_i32_0 = arith.constant 0 : i32
    %c0_i32_1 = arith.constant 0 : i32
    return %arg0, %c0_i32, %c0_i32_0 : i32, i32, i32
  }
  func.func @transform_1(%arg0: i32) -> (i32, i32) {
    %c0_i32 = arith.constant 0 : i32
    %c0_i32_0 = arith.constant 0 : i32
    return %arg0, %c0_i32 : i32, i32
  }
  func.func @transform_2(%arg0: i32) -> (i32, i32, i32) {
    %c0_i32 = arith.constant 0 : i32
    %c0_i32_0 = arith.constant 0 : i32
    %c0_i32_1 = arith.constant 0 : i32
    return %arg0, %c0_i32, %c0_i32_0 : i32, i32, i32
  }
  func.func @transform_3(%arg0: i32) -> (i32, i32) {
    %c0_i32 = arith.constant 0 : i32
    %c0_i32_0 = arith.constant 0 : i32
    return %arg0, %c0_i32 : i32, i32
  }
  func.func @transform_4(%arg0: i32) -> (i32, i32) {
    %c0_i32 = arith.constant 0 : i32
    %c0_i32_0 = arith.constant 0 : i32
    return %arg0, %c0_i32 : i32, i32
  }
  func.func @transform_5(%arg0: i32) -> (i32, i32) {
    %c0_i32 = arith.constant 0 : i32
    %c0_i32_0 = arith.constant 0 : i32
    %c0_i32_1 = arith.constant 0 : i32
    return %c0_i32, %c0_i32_0 : i32, i32
  }
  func.func @transform_6(%arg0: i32) -> (i32, i32) {
    %c0_i32 = arith.constant 0 : i32
    %c0_i32_0 = arith.constant 0 : i32
    %c0_i32_1 = arith.constant 0 : i32
    return %c0_i32, %c0_i32_0 : i32, i32
  }
  func.func @transform_7(%arg0: i32) -> (i32, i32) {
    %c0_i32 = arith.constant 0 : i32
    %c0_i32_0 = arith.constant 0 : i32
    %c0_i32_1 = arith.constant 0 : i32
    return %c0_i32, %c0_i32_0 : i32, i32
  }
  func.func @transform_8(%arg0: i32) -> (i32, i32) {
    %c0_i32 = arith.constant 0 : i32
    %c0_i32_0 = arith.constant 0 : i32
    %c0_i32_1 = arith.constant 0 : i32
    return %c0_i32, %c0_i32_0 : i32, i32
  }
  func.func @transform_9(%arg0: i32) -> (i32, i32) {
    %c0_i32 = arith.constant 0 : i32
    %c0_i32_0 = arith.constant 0 : i32
    %c0_i32_1 = arith.constant 0 : i32
    return %c0_i32, %c0_i32_0 : i32, i32
  }
  func.func @transform_10(%arg0: i32) -> (i32, i32) {
    %c0_i32 = arith.constant 0 : i32
    %c0_i32_0 = arith.constant 0 : i32
    %c0_i32_1 = arith.constant 0 : i32
    return %c0_i32, %c0_i32_0 : i32, i32
  }
  func.func @transform_11(%arg0: i32) -> (i32, i32) {
    %c0_i32 = arith.constant 0 : i32
    %c0_i32_0 = arith.constant 0 : i32
    %c0_i32_1 = arith.constant 0 : i32
    return %c0_i32, %c0_i32_0 : i32, i32
  }
  func.func @transform_12(%arg0: i32) -> (i32, i32) {
    %c0_i32 = arith.constant 0 : i32
    %c0_i32_0 = arith.constant 0 : i32
    %c0_i32_1 = arith.constant 0 : i32
    return %c0_i32, %c0_i32_0 : i32, i32
  }
  func.func @transform_13(%arg0: i32) -> (i32, i32) {
    %c0_i32 = arith.constant 0 : i32
    %c0_i32_0 = arith.constant 0 : i32
    %c0_i32_1 = arith.constant 0 : i32
    return %c0_i32, %c0_i32_0 : i32, i32
  }
  func.func @transform_14(%arg0: i32) -> (i32, i32) {
    %c0_i32 = arith.constant 0 : i32
    %c0_i32_0 = arith.constant 0 : i32
    %c0_i32_1 = arith.constant 0 : i32
    return %c0_i32, %c0_i32_0 : i32, i32
  }
  func.func @transform_15(%arg0: i32) -> (i32, i32) {
    %c0_i32 = arith.constant 0 : i32
    %c0_i32_0 = arith.constant 0 : i32
    %c0_i32_1 = arith.constant 0 : i32
    return %c0_i32, %c0_i32_0 : i32, i32
  }
  func.func @transform_16(%arg0: i32) -> (i32, i32) {
    %c0_i32 = arith.constant 0 : i32
    %c0_i32_0 = arith.constant 0 : i32
    return %arg0, %c0_i32 : i32, i32
  }
  func.func @transform_17(%arg0: i32) -> (i32, i32) {
    %c0_i32 = arith.constant 0 : i32
    %c0_i32_0 = arith.constant 0 : i32
    return %arg0, %c0_i32 : i32, i32
  }
}

</mosaic_0001>

<bundles_post_ra>
// kernel: arm_forward.1
= control target key start
LH: loop header
LB: loop body
LE: loop exit
PB: predicated region body
PF: predicated region fallthrough
CT: control target
= control target key end

     0   :  { %s2447_s0 = inlined_call_operand.vmem [shape: f32[8,8,32], index: 0, kind: input, shape index: {}]   ;;  %s2448_s1 = inlined_call_operand.vmem [shape: f32[8,8], index: 1, kind: input, shape index: {}]   ;;  %s2449_s2 = inlined_call_operand.vmem [shape: f32[8,8,32], index: 2, kind: input, shape index: {}]   ;;  %s2450_s3 = inlined_call_operand.vmem [shape: f32[8,8], index: 3, kind: input, shape index: {}]   ;;  %s2451_s4 = inlined_call_operand.vmem [shape: f32[8,16], index: 4, kind: input, shape index: {}]   ;;  %s2452_s5 = inlined_call_operand.vmem [shape: f32[32,2], index: 5, kind: input, shape index: {}]   ;;  %s2453_s6 = inlined_call_operand.vmem [shape: f32[64,16], index: 6, kind: input, shape index: {}]   ;;  %s2454_s7 = inlined_call_operand.vmem [shape: f32[32,2], index: 7, kind: input, shape index: {}]   ;;  %s2455_s8 = inlined_call_operand.vmem [shape: f32[64,16], index: 8, kind: input, shape index: {}]   ;;  %s2456_s9 = inlined_call_operand.vmem [shape: f32[16,32], index: 9, kind: input, shape index: {}]   ;;  %s2457_s10 = inlined_call_operand.vmem [shape: f32[16,32], index: 10, kind: input, shape index: {}]   ;;  %s2458_s11 = inlined_call_operand.vmem [shape: f32[1,32], index: 11, kind: input, shape index: {}]   ;;  %s2459_s12 = inlined_call_operand.vmem [shape: f32[32,128], index: 12, kind: input, shape index: {}]   ;;  %s2460_s13 = inlined_call_operand.vmem [shape: f32[1,128], index: 13, kind: input, shape index: {}]   ;;  %s2461_s14 = inlined_call_operand.vmem [shape: f32[128,128], index: 14, kind: input, shape index: {}]   ;;  %s2462_s15 = inlined_call_operand.vmem [shape: f32[1,128], index: 15, kind: input, shape index: {}]   ;;  %s2463_s16 = inlined_call_operand.hbm [shape: f32[8,128], index: 16, kind: output, shape index: {0}]   ;;  %s2464_s17 = inlined_call_operand.hbm [shape: f32[8,128], index: 17, kind: output, shape index: {1}]  }
   0x1   :  { %2466 = sst [smem:[#allocation8_spill]] %s2447_s0 }
   0x2   :  { %2467 = sst [smem:[#allocation9_spill]] %s2448_s1 }
   0x3   :  { %23 = vsyncpa [#allocation3], 0  ;;  %v69_v0 = vld [vmem:[%s2452_s5 + $0x18] sm:$0xff]  ;;  %v68_v1 = vld [vmem:[%s2452_s5 + $0x10] sm:$0xff]  ;;  %s2468_s0 = sld [smem:[#allocation8_spill]] }
   0x4   :  { %115 = vmatpush.msra.mxu0 %v69_v0  ;;  %v67_v4 = vld [vmem:[%s2452_s5 + $0x8] sm:$0xff]  ;;  %v66_v7 = vld [vmem:[%s2452_s5] sm:$0xff] }
   0x6   :  { %116 = vmatpush.msra.mxu0 %v68_v1 }
   0x9   :  { %v57_v2 = vld [vmem:[%s2468_s0] sm:$0xff]  ;;  %v58_v3 = vld [vmem:[%s2468_s0 + $0x8] sm:$0xff]  ;;  %v59_v5 = vld [vmem:[%s2468_s0 + $0x10] sm:$0xff] }
   0xa   :  { %v61_v6 = vld [vmem:[%s2468_s0 + $0x20] sm:$0xff]  ;;  %586 = vmatpush.msra.mxu2 %v58_v3  ;;  %563 = vmatpush.msra.mxu3 %v57_v2 }
   0xc   :  { %655 = vmatpush.msrb.mxu2 %v61_v6  ;;  %609 = vmatpush.msrb.mxu3 %v59_v5 }
   0xd   :  { %24 = vsyncpa [#allocation5], 0  ;;  %117 = vmatpush.msra.mxu0 %v67_v4  ;;  %vm78_vm0 = vcmask 261120   ;;  %v60_v8 = vld [vmem:[%s2468_s0 + $0x18] sm:$0xff]  ;;  %v63_v9 = vld [vmem:[%s2468_s0 + $0x30] sm:$0xff]  ;;  %s2469_s20 = sld [smem:[#allocation9_spill]] }
   0xe   :  { %701 = vmatpush.msra.mxu1 %v63_v9  ;;  %v2025_v10 = vld [vmem:[%s2468_s0 + $0x28] sm:$0xff]  ;;  %v2033_v11 = vld [vmem:[%s2468_s0 + $0x38] sm:$0xff]  ;;  %v1891_v22 = vmov 0   ;;  %vm455_vm3 = vcmask 58368   ;;  %vm544_vm14 = vcmask 64512   ;;  %s1896_s28 = smov [#allocation2]  }
   0xf   :  { %118 = vmatpush.msra.mxu0 %v66_v7  ;;  %s1697_s29 = sshll.u32 %s1896_s28, 4  ;;  %s1698_s29 = int_to_ptr.vmem [resolvable:$true] %s1697_s29 }
  0x10   :  { %1724 = vmatmul.msk.f32.vlgmr.msra.gmra.mxu0 %vm78_vm0, %v57_v2 }
  0x11   :  { %632 = vmatpush.msrb.mxu0 %v60_v8 }
  0x13   :  { %v2042_v20 = vld [vmem:[%s2469_s20] sm:$0xff] }
  0x14   :  { %v401_v21 = vrot.slane %v2042_v20, 1  ;;  %v406_v28 = vrot.slane %v2042_v20, 6  ;;  %v404_v29 = vrot.slane %v2042_v20, 4  ;;  %v402_v34 = vrot.slane %v2042_v20, 2 }
  0x15   :  { %v407_v41 = vrot.slane %v2042_v20, 7  ;;  %v405_v55 = vrot.slane %v2042_v20, 5  ;;  %vm415_vm15 = vcmp.gt.f32.partialorder %v2042_v20, 0.0 }
  0x16   :  { %vm416_vm1 = vcmp.gt.f32.partialorder %v401_v21, 0.0  ;;  %vm421_vm4 = vcmp.gt.f32.partialorder %v406_v28, 0.0  ;;  %vm419_vm5 = vcmp.gt.f32.partialorder %v404_v29, 0.0  ;;  %vm417_vm7 = vcmp.gt.f32.partialorder %v402_v34, 0.0 }
  0x17   :  { %v424_v23 = vsel %vm416_vm1, 1, %v1891_v22  ;;  %v429_v31 = vsel %vm421_vm4, 1, %v1891_v22  ;;  %v427_v33 = vsel %vm419_vm5, 1, %v1891_v22  ;;  %v425_v40 = vsel %vm417_vm7, 1, %v1891_v22 }
  0x18   :  { %1725 = vmatmul.msk.f32.gmra.mxu0 %vm78_vm0, %v58_v3  ;;  %v432_v24 = vperm.slane %v424_v23, 0  ;;  %v437_v32 = vperm.slane %v429_v31, 0  ;;  %v435_v35 = vperm.slane %v427_v33, 0  ;;  %v433_v43 = vperm.slane %v425_v40, 0 }
  0x19   :  { %vm422_vm9 = vcmp.gt.f32.partialorder %v407_v41, 0.0  ;;  %vm420_vm12 = vcmp.gt.f32.partialorder %v405_v55, 0.0  ;;  %v423_v34 = vsel %vm415_vm15, 1, %v1891_v22 }
  0x1a   :  { %vm440_vm2 = vcmp.eq.s32.totalorder %v432_v24, 1  ;;  %vm445_vm6 = vcmp.eq.s32.totalorder %v437_v32, 1  ;;  %vm443_vm8 = vcmp.eq.s32.totalorder %v435_v35, 1  ;;  %vm441_vm10 = vcmp.eq.s32.totalorder %v433_v43, 1  ;;  %v812_v24 = vld [vmem:[%s2454_s7 + $0x18] sm:$0xff]  ;;  %v800_v32 = vld [vmem:[%s2449_s2] sm:$0xff] }
  0x1b   :  { %v430_v46 = vsel %vm422_vm9, 1, %v1891_v22  ;;  %v428_v58 = vsel %vm420_vm12, 1, %v1891_v22  ;;  %857 = vmatpush.msrb.mxu1 %v812_v24  ;;  %v801_v35 = vld [vmem:[%s2449_s2 + $0x8] sm:$0xff]  ;;  %v2116_v43 = vld [vmem:[%s2449_s2 + $0x18] sm:$0xff] }
  0x1c   :  { %v438_v48 = vperm.slane %v430_v46, 0  ;;  %v436_v60 = vperm.slane %v428_v58, 0 }
  0x1e   :  { %vm446_vm11 = vcmp.eq.s32.totalorder %v438_v48, 1  ;;  %vm444_vm13 = vcmp.eq.s32.totalorder %v436_v60, 1 }
  0x20   :  { %1726 = vmatmul.msk.f32.gmra.mxu0 %vm78_vm0, %v59_v5 }
  0x28   :  { %1727 = vmatmul.msk.f32.gmra.mxu0 %vm78_vm0, %v60_v8 }
  0x30   :  { %1728 = vmatmul.msk.f32.gmra.mxu0 %vm78_vm0, %v61_v6 }
  0x38   :  { %1729 = vmatmul.msk.f32.gmra.mxu0 %vm78_vm0, %v2025_v10 }
  0x40   :  { %1730 = vmatmul.msk.f32.gmra.mxu0 %vm78_vm0, %v63_v9 }
  0x48   :  { %1731 = vmatmul.msk.f32.gmra.mxu0 %vm78_vm0, %v2033_v11 }
  0x8d   :  { %v120_v12 = vpop.f32.mrf.mxu0 }
  0x8e   :  { %144 = vxpose.xlu2.b32.start.end [1/1] (short) (narrow) %v120_v12, 8 }
  0x95   :  { %v123_v13 = vpop.f32.mrf.mxu0 }
  0x96   :  { %176 = vxpose.xlu1.b32.start.end [1/1] (short) (narrow) %v123_v13, 8 }
  0x9d   :  { %v126_v14 = vpop.f32.mrf.mxu0 }
  0xa5   :  { %v2037_v15 = vpop.f32.mrf.mxu0 }
  0xad   :  { %v132_v16 = vpop.f32.mrf.mxu0 }
  0xae   :  { %272 = vxpose.xlu2.b32.start.end [1/1] (short) (narrow) %v132_v16, 8 }
  0xb5   :  { %v135_v17 = vpop.f32.mrf.mxu0 }
  0xb6   :  { %208 = vxpose.xlu2.b32.start.end [1/1] (short) (narrow) %v126_v14, 8 }
  0xbd   :  { %v138_v18 = vpop.f32.mrf.mxu0 }
  0xbe   :  { %336 = vxpose.xlu0.b32.start.end [1/1] (short) (narrow) %v138_v18, 8 }
  0xc5   :  { %v141_v19 = vpop.f32.mrf.mxu0 }
  0xc6   :  { %368 = vxpose.xlu2.b32.start.end [1/1] (short) (narrow) %v141_v19, 8 }
  0xce   :  { %304 = vxpose.xlu2.b32.start.end [1/1] (short) (narrow) %v135_v17, 8 }
 0x127   :  { %v2049_v30 = vpop.trf.xlu2 }
 0x13a   :  { %v192_v25 = vpop.trf.xlu1 }
 0x13b   :  { %v448_v26 = vsel %vm440_vm2, %v192_v25, -1e+30  ;;  %v811_v25 = vld [vmem:[%s2454_s7 + $0x10] sm:$0xff] }
 0x13c   :  { %v459_v27 = vsel %vm455_vm3, %v448_v26, -inf  ;;  %858 = vmatpush.msrb.mxu1 %v811_v25 }
 0x13f   :  { %460 = vmax.xlane.f32.xlu2 %v459_v27 }
 0x147   :  { %v288_v37 = vpop.trf.xlu2 }
 0x148   :  { %v451_v42 = vsel %vm443_vm8, %v288_v37, -1e+30  ;;  %v431_v37 = vperm.slane %v423_v34, 0 }
 0x149   :  { %v468_v44 = vsel %vm455_vm3, %v451_v42, -inf }
 0x14a   :  { %vm439_vm1 = vcmp.eq.s32.totalorder %v431_v37, 1 }
 0x14b   :  { %v447_v41 = vsel %vm439_vm1, %v2049_v30, -1e+30 }
 0x14f   :  { %v224_v45 = vpop.trf.xlu2 }
 0x150   :  { %v2059_v47 = vsel %vm441_vm10, %v224_v45, -1e+30  ;;  %v2127_v45 = vld [vmem:[%s2449_s2 + $0x20] sm:$0xff] }
 0x151   :  { %v462_v49 = vsel %vm455_vm3, %v2059_v47, -inf }
 0x15f   :  { %v384_v50 = vpop.trf.xlu2 }
 0x160   :  { %v454_v51 = vsel %vm446_vm11, %v384_v50, -1e+30 }
 0x161   :  { %v477_v52 = vsel %vm455_vm3, %v454_v51, -inf }
 0x162   :  { %v352_v36 = vpop.trf.xlu0 }
 0x163   :  { %v453_v38 = vsel %vm445_vm6, %v352_v36, -1e+30 }
 0x164   :  { %v474_v39 = vsel %vm455_vm3, %v453_v38, -inf }
 0x165   :  { %475 = vmax.xlane.f32.xlu0 %v474_v39  ;;  %v2107_v39 = vld [vmem:[%s2449_s2 + $0x10] sm:$0xff] }
 0x167   :  { %v320_v53 = vpop.trf.xlu2 }
 0x168   :  { %v2067_v62 = vsel %vm444_vm13, %v320_v53, -1e+30  ;;  %v403_v53 = vrot.slane %v2042_v20, 3 }
 0x169   :  { %v471_v63 = vsel %vm455_vm3, %v2067_v62, -inf }
 0x16a   :  { %vm418_vm2 = vcmp.gt.f32.partialorder %v403_v53, 0.0 }
 0x16d   :  { %469 = vmax.xlane.f32.xlu0 %v468_v44 }
 0x175   :  { %463 = vmax.xlane.f32.xlu0 %v462_v49  ;;  %v2134_v49 = vld [vmem:[%s2449_s2 + $0x28] sm:$0xff] }
 0x17d   :  { %478 = vmax.xlane.f32.xlu0 %v477_v52  ;;  %v2149_v52 = vld [vmem:[%s2449_s2 + $0x38] sm:$0xff] }
 0x185   :  { %472 = vmax.xlane.f32.xlu0 %v471_v63 }
 0x1b2   :  { %v461_v54 = vpop.xlane.xlu2 %460 }
 0x1b3   :  { %v481_v56 = vsub.f32 %v448_v26, %v461_v54  ;;  %v809_v26 = vld [vmem:[%s2454_s7] sm:$0xff]  ;;  %v426_v54 = vsel %vm418_vm2, 1, %v1891_v22 }
 0x1b4   :  { %v434_v55 = vperm.slane %v426_v54, 0 }
 0x1b5   :  { %v490_v57 = vmul.f32 1.442695, %v481_v56 }
 0x1b6   :  { %vm442_vm4 = vcmp.eq.s32.totalorder %v434_v55, 1 }
 0x1b7   :  { %1771 = vpow2.f32 %v490_v57 }
 0x1bd   :  { %v1772_v59 = vpop.eup %1771 }
 0x1be   :  { %v507_v61 = vsel %vm455_vm3, %v1772_v59, 0.0 }
 0x1bf   :  { %508 = vadd.xlane.f32.xlu2 %v507_v61 }
 0x1d8   :  { %v476_v0 = vpop.xlane.xlu0 %475 }
 0x1d9   :  { %v486_v1 = vsub.f32 %v453_v38, %v476_v0 }
 0x1db   :  { %v500_v2 = vmul.f32 1.442695, %v486_v1 }
 0x1dd   :  { %1773 = vpow2.f32 %v500_v2 }
 0x1e0   :  { %v470_v3 = vpop.xlane.xlu0 %469 }
 0x1e1   :  { %v484_v4 = vsub.f32 %v451_v42, %v470_v3  ;;  %v456_v42 = vsel %vm455_vm3, %v447_v41, -inf }
 0x1e3   :  { %v1774_v5 = vpop.eup %1773  ;;  %v496_v6 = vmul.f32 1.442695, %v484_v4 }
 0x1e4   :  { %v522_v7 = vsel %vm455_vm3, %v1774_v5, 0.0 }
 0x1e5   :  { %1775 = vpow2.f32 %v496_v6  ;;  %523 = vadd.xlane.f32.xlu1 %v522_v7 }
 0x1e8   :  { %v2073_v12 = vpop.xlane.xlu0 %463 }
 0x1e9   :  { %v482_v20 = vsub.f32 %v2059_v47, %v2073_v12 }
 0x1eb   :  { %v1776_v8 = vpop.eup %1775  ;;  %v492_v2 = vmul.f32 1.442695, %v482_v20 }
 0x1ec   :  { %v516_v9 = vsel %vm455_vm3, %v1776_v8, 0.0 }
 0x1ed   :  { %517 = vadd.xlane.f32.xlu2 %v516_v9 }
 0x1f0   :  { %v479_v13 = vpop.xlane.xlu0 %478 }
 0x1f1   :  { %v487_v14 = vsub.f32 %v454_v51, %v479_v13  ;;  %v2142_v51 = vld [vmem:[%s2449_s2 + $0x30] sm:$0xff] }
 0x1f3   :  { %v502_v16 = vmul.f32 1.442695, %v487_v14 }
 0x1f5   :  { %1777 = vpow2.f32 %v502_v16 }
 0x1f8   :  { %v473_v36 = vpop.xlane.xlu0 %472 }
 0x1f9   :  { %v485_v38 = vsub.f32 %v2067_v62, %v473_v36 }
 0x1fb   :  { %v1778_v17 = vpop.eup %1777  ;;  %v498_v40 = vmul.f32 1.442695, %v485_v38 }
 0x1fc   :  { %v525_v18 = vsel %vm455_vm3, %v1778_v17, 0.0 }
 0x1fd   :  { %526 = vadd.xlane.f32.xlu2 %v525_v18 }
 0x21f   :  { %240 = vxpose.xlu1.b32.start.end [1/1] (short) (narrow) %v2037_v15, 8  ;;  %v810_v15 = vld [vmem:[%s2454_s7 + $0x8] sm:$0xff] }
 0x220   :  { %859 = vmatpush.msrb.mxu1 %v810_v15 }
 0x222   :  { %860 = vmatpush.msrb.mxu1 %v809_v26  ;;  %v2168_v26 = vld [vmem:[%s2450_s3] sm:$0xff]  ;;  %s1894_s3 = smov 32  }
 0x223   :  { %vm1157_vm13 = vcmp.gt.f32.partialorder %v2168_v26, 0.0 }
 0x232   :  { %v509_v19 = vpop.xlane.xlu2 %508 }
 0x233   :  { %1779 = vrcp.f32 %v509_v19 }
 0x239   :  { %v1780_v21 = vpop.eup %1779 }
 0x23a   :  { %v537_v23 = vmul.f32 %v1780_v21, %v1772_v59 }
 0x23c   :  { %1733 = vmatmul.msk.f32.vlgmr.msra.gmra.mxu2 %vm544_vm14, %v537_v23 }
 0x23d   :  { %724 = vmatpush.msra.mxu2 %v2033_v11 }
 0x258   :  { %v524_v27 = vpop.xlane.xlu1 %523 }
 0x259   :  { %1781 = vrcp.f32 %v524_v27 }
 0x25f   :  { %v1782_v28 = vpop.eup %1781 }
 0x260   :  { %v518_v29 = vpop.xlane.xlu2 %517  ;;  %v542_v31 = vmul.f32 %v1782_v28, %v1774_v5  ;;  %v1143_v28 = vrot.slane %v2168_v26, 1 }
 0x261   :  { %1783 = vrcp.f32 %v518_v29 }
 0x262   :  { %1738 = vmatmul.msk.f32.vlgmr.msra.gmra.mxu1 %vm544_vm14, %v542_v31  ;;  %1785 = vpow2.f32 %v498_v40  ;;  %vm1158_vm5 = vcmp.gt.f32.partialorder %v1143_v28, 0.0  ;;  %v1144_v31 = vrot.slane %v2168_v26, 2 }
 0x264   :  { %vm1159_vm6 = vcmp.gt.f32.partialorder %v1144_v31, 0.0 }
 0x265   :  { %v1167_v34 = vsel %vm1159_vm6, 1, %v1891_v22 }
 0x266   :  { %v1175_v36 = vperm.slane %v1167_v34, 0 }
 0x267   :  { %v1784_v11 = vpop.eup %1783 }
 0x268   :  { %v540_v33 = vmul.f32 %v1784_v11, %v1776_v8  ;;  %v2118_v44 = vpop.eup %1785  ;;  %vm1183_vm9 = vcmp.eq.s32.totalorder %v1175_v36, 1 }
 0x269   :  { %v519_v30 = vsel %vm455_vm3, %v2118_v44, 0.0 }
 0x26a   :  { %1736 = vmatmul.msk.f32.vlgmr.msrb.gmra.mxu2 %vm544_vm14, %v540_v33  ;;  %1741 = vmatmul.msk.f32.vlgmr.msrb.gmra.mxu1 %vm78_vm0, %v800_v32 }
 0x26b   :  { %1303 = vmatpush.msrb.mxu2 %v800_v32 }
 0x270   :  { %v527_v46 = vpop.xlane.xlu2 %526 }
 0x271   :  { %1787 = vrcp.f32 %v527_v46 }
 0x272   :  { %1742 = vmatmul.msk.f32.gmra.mxu1 %vm78_vm0, %v801_v35 }
 0x277   :  { %v1788_v48 = vpop.eup %1787 }
 0x278   :  { %v543_v50 = vmul.f32 %v1788_v48, %v1778_v17 }
 0x27a   :  { %1743 = vmatmul.msk.f32.gmra.mxu1 %vm78_vm0, %v2107_v39  ;;  %1739 = vmatmul.msk.f32.vlgmr.msra.gmra.mxu2 %vm544_vm14, %v543_v50  ;;  %v1148_v50 = vrot.slane %v2168_v26, 6 }
 0x27b   :  { %1326 = vmatpush.msra.mxu2 %v801_v35  ;;  %v1146_v35 = vrot.slane %v2168_v26, 4 }
 0x27c   :  { %vm1163_vm11 = vcmp.gt.f32.partialorder %v1148_v50, 0.0 }
 0x27d   :  { %vm1161_vm8 = vcmp.gt.f32.partialorder %v1146_v35, 0.0  ;;  %v1171_v55 = vsel %vm1163_vm11, 1, %v1891_v22 }
 0x27f   :  { %457 = vmax.xlane.f32.xlu1 %v456_v42  ;;  %v1169_v42 = vsel %vm1161_vm8, 1, %v1891_v22  ;;  %vm730_vm8 = vcmask 1047556  }
 0x282   :  { %1744 = vmatmul.msk.f32.gmra.mxu1 %vm78_vm0, %v2116_v43 }
 0x287   :  { %520 = vadd.xlane.f32.xlu1 %v519_v30  ;;  %v1177_v30 = vperm.slane %v1169_v42, 0 }
 0x289   :  { %vm1185_vm10 = vcmp.eq.s32.totalorder %v1177_v30, 1 }
 0x28a   :  { %1745 = vmatmul.msk.f32.gmra.mxu1 %vm78_vm0, %v2127_v45 }
 0x292   :  { %1746 = vmatmul.msk.f32.gmra.mxu1 %vm78_vm0, %v2134_v49 }
 0x29a   :  { %1747 = vmatmul.msk.f32.gmra.mxu1 %vm78_vm0, %v2142_v51 }
 0x2a2   :  { %1748 = vmatmul.msk.f32.gmra.mxu1 %vm78_vm0, %v2149_v52 }
 0x2bf   :  { %v588_v35 = vpop.f32.mrf.mxu2 }
 0x2c3   :  { %v256_v56 = vpop.trf.xlu1 }
 0x2c4   :  { %v450_v57 = vsel %vm442_vm4, %v256_v56, -1e+30 }
 0x2c5   :  { %v465_v58 = vsel %vm455_vm3, %v450_v57, -inf }
 0x2c6   :  { %466 = vmax.xlane.f32.xlu0 %v465_v58 }
 0x2df   :  { %v2156_v59 = vpop.f32.mrf.mxu1 }
 0x2e7   :  { %v862_v60 = vpop.f32.mrf.mxu1 }
 0x2e8   :  { %886 = vxpose.xlu2.b32.start.end [1/1] (short) (narrow) %v862_v60, 8 }
 0x2ed   :  { %v657_v42 = vpop.f32.mrf.mxu2 }
 0x2ef   :  { %v865_v61 = vpop.f32.mrf.mxu1 }
 0x2f0   :  { %918 = vxpose.xlu1.b32.start.end [1/1] (short) (narrow) %v865_v61, 8 }
 0x2f2   :  { %v458_v62 = vpop.xlane.xlu1 %457 }
 0x2f3   :  { %v480_v63 = vsub.f32 %v447_v41, %v458_v62 }
 0x2f5   :  { %v488_v0 = vmul.f32 1.442695, %v480_v63 }
 0x2f7   :  { %1789 = vpow2.f32 %v488_v0  ;;  %v868_v1 = vpop.f32.mrf.mxu1  ;;  %v1165_v0 = vsel %vm1157_vm13, 1, %v1891_v22 }
 0x2f8   :  { %950 = vxpose.xlu2.b32.start.end [1/1] (short) (narrow) %v868_v1, 8  ;;  %1791 = vpow2.f32 %v492_v2  ;;  %v1147_v1 = vrot.slane %v2168_v26, 5  ;;  %v1173_v2 = vperm.slane %v1165_v0, 0 }
 0x2fa   :  { %v521_v25 = vpop.xlane.xlu1 %520  ;;  %vm1162_vm15 = vcmp.gt.f32.partialorder %v1147_v1, 0.0  ;;  %vm1181_vm1 = vcmp.eq.s32.totalorder %v1173_v2, 1 }
 0x2fd   :  { %v1790_v3 = vpop.eup %1789 }
 0x2fe   :  { %v504_v4 = vsel %vm455_vm3, %v1790_v3, 0.0  ;;  %v1792_v6 = vpop.eup %1791 }
 0x2ff   :  { %v871_v5 = vpop.f32.mrf.mxu1  ;;  %505 = vadd.xlane.f32.xlu0 %v504_v4  ;;  %v510_v7 = vsel %vm455_vm3, %v1792_v6, 0.0  ;;  %v1149_v4 = vrot.slane %v2168_v26, 7 }
 0x301   :  { %vm1164_vm2 = vcmp.gt.f32.partialorder %v1149_v4, 0.0 }
 0x307   :  { %v874_v8 = vpop.f32.mrf.mxu1  ;;  %511 = vadd.xlane.f32.xlu0 %v510_v7 }
 0x308   :  { %1014 = vxpose.xlu2.b32.start.end [1/1] (short) (narrow) %v874_v8, 8  ;;  %v1172_v8 = vsel %vm1164_vm2, 1, %v1891_v22 }
 0x30f   :  { %v877_v9 = vpop.f32.mrf.mxu1 }
 0x310   :  { %1046 = vxpose.xlu2.b32.start.end [1/1] (short) (narrow) %v877_v9, 8 }
 0x317   :  { %v880_v47 = vpop.f32.mrf.mxu1 }
 0x318   :  { %1078 = vxpose.xlu2.b32.start.end [1/1] (short) (narrow) %v880_v47, 8  ;;  %v1180_v47 = vperm.slane %v1172_v8, 0 }
 0x31f   :  { %v883_v12 = vpop.f32.mrf.mxu1 }
 0x320   :  { %1110 = vxpose.xlu2.b32.start.end [1/1] (short) (narrow) %v883_v12, 8 }
 0x339   :  { %v467_v13 = vpop.xlane.xlu0 %466 }
 0x33a   :  { %v483_v14 = vsub.f32 %v450_v57, %v467_v13  ;;  %v1179_v57 = vperm.slane %v1171_v55, 0 }
 0x33c   :  { %v494_v16 = vmul.f32 1.442695, %v483_v14  ;;  %vm1187_vm12 = vcmp.eq.s32.totalorder %v1179_v57, 1 }
 0x33e   :  { %1793 = vpow2.f32 %v494_v16 }
 0x344   :  { %v1794_v17 = vpop.eup %1793 }
 0x345   :  { %v513_v18 = vsel %vm455_vm3, %v1794_v17, 0.0 }
 0x346   :  { %514 = vadd.xlane.f32.xlu0 %v513_v18 }
 0x36f   :  { %982 = vxpose.xlu0.b32.start.end [1/1] (short) (narrow) %v871_v5, 8 }
 0x372   :  { %v506_v19 = vpop.xlane.xlu0 %505 }
 0x373   :  { %1795 = vrcp.f32 %v506_v19 }
 0x379   :  { %v1796_v21 = vpop.eup %1795 }
 0x37a   :  { %v512_v23 = vpop.xlane.xlu0 %511  ;;  %v536_v24 = vmul.f32 %v1796_v21, %v1790_v3  ;;  %v1170_v3 = vsel %vm1162_vm15, 1, %v1891_v22 }
 0x37b   :  { %1797 = vrcp.f32 %v512_v23 }
 0x37c   :  { %1732 = vmatmul.msk.f32.vlgmr.msra.gmra.mxu3 %vm544_vm14, %v536_v24  ;;  %1799 = vrcp.f32 %v521_v25 }
 0x37d   :  { %678 = vmatpush.msra.mxu3 %v2025_v10  ;;  %v1166_v10 = vsel %vm1158_vm5, 1, %v1891_v22  ;;  %vm1188_vm5 = vcmp.eq.s32.totalorder %v1180_v47, 1 }
 0x37e   :  { %v1174_v33 = vperm.slane %v1166_v10, 0 }
 0x380   :  { %vm1182_vm7 = vcmp.eq.s32.totalorder %v1174_v33, 1 }
 0x381   :  { %v1798_v15 = vpop.eup %1797  ;;  %v902_v32 = vpop.trf.xlu2 }
 0x382   :  { %v538_v27 = vmul.f32 %v1798_v15, %v1792_v6  ;;  %v1800_v29 = vpop.eup %1799  ;;  %v2197_v5 = vsel %vm1181_vm1, %v902_v32, -1e+30  ;;  %v1178_v6 = vperm.slane %v1170_v3, 0 }
 0x383   :  { %v541_v11 = vmul.f32 %v1800_v29, %v2118_v44  ;;  %v1197_v7 = vsel %vm455_vm3, %v2197_v5, -inf }
 0x384   :  { %1734 = vmatmul.msk.f32.vlgmr.msrb.gmra.mxu3 %vm544_vm14, %v538_v27  ;;  %vm1186_vm4 = vcmp.eq.s32.totalorder %v1178_v6, 1 }
 0x38c   :  { %1737 = vmatmul.msk.f32.vlgmr.msra.gmra.mxu3 %vm544_vm14, %v541_v11 }
 0x391   :  { %v966_v41 = vpop.trf.xlu2 }
 0x392   :  { %v1191_v44 = vsel %vm1183_vm9, %v966_v41, -1e+30  ;;  %vm1544_vm9 = vcmask 130048  }
 0x393   :  { %v1203_v46 = vsel %vm455_vm3, %v1191_v44, -inf }
 0x394   :  { %v934_v37 = vpop.trf.xlu1 }
 0x395   :  { %v1190_v38 = vsel %vm1182_vm7, %v934_v37, -1e+30 }
 0x396   :  { %v1200_v40 = vsel %vm455_vm3, %v1190_v38, -inf }
 0x397   :  { %1201 = vmax.xlane.f32.xlu1 %v1200_v40 }
 0x39f   :  { %1204 = vmax.xlane.f32.xlu1 %v1203_v46 }
 0x3a1   :  { %v1030_v48 = vpop.trf.xlu2 }
 0x3a2   :  { %v2182_v53 = vsel %vm1185_vm10, %v1030_v48, -1e+30  ;;  %v726_v48 = vpop.f32.mrf.mxu2 }
 0x3a3   :  { %v1209_v54 = vsel %vm455_vm3, %v2182_v53, -inf }
 0x3a7   :  { %1210 = vmax.xlane.f32.xlu1 %v1209_v54 }
 0x3a9   :  { %v1062_v56 = vpop.trf.xlu2 }
 0x3aa   :  { %v2202_v9 = vsel %vm1186_vm4, %v1062_v56, -1e+30  ;;  %v748_v56 = vrot.slane %v726_v48, 4 }
 0x3ab   :  { %v1212_v12 = vsel %vm455_vm3, %v2202_v9, -inf }
 0x3b1   :  { %v1094_v58 = vpop.trf.xlu2 }
 0x3b2   :  { %v2187_v60 = vsel %vm1187_vm12, %v1094_v58, -1e+30 }
 0x3b3   :  { %v1215_v61 = vsel %vm455_vm3, %v2187_v60, -inf }
 0x3b4   :  { %1216 = vmax.xlane.f32.xlu1 %v1215_v61  ;;  %v742_v61 = vrot.slane %v2156_v59, 4 }
 0x3b9   :  { %v515_v62 = vpop.xlane.xlu0 %514  ;;  %v1126_v13 = vpop.trf.xlu2 }
 0x3ba   :  { %1801 = vrcp.f32 %v515_v62  ;;  %v2206_v14 = vsel %vm1188_vm5, %v1126_v13, -1e+30  ;;  %v743_v62 = vsel %vm730_vm8, %v742_v61, %v657_v42  ;;  %v70_v61 = vld [vmem:[%s2453_s6] sm:$0xff] }
 0x3bb   :  { %v1218_v16 = vsel %vm455_vm3, %v2206_v14, -inf }
 0x3c0   :  { %v1802_v63 = vpop.eup %1801 }
 0x3c1   :  { %v539_v20 = vmul.f32 %v1802_v63, %v1794_v17  ;;  %v1145_v17 = vrot.slane %v2168_v26, 3  ;;  %v1893_v63 = vmov 1934713408  }
 0x3c3   :  { %1735 = vmatmul.msk.f32.vlgmr.msrb.gmra.mxu0 %vm544_vm14, %v539_v20  ;;  %vm1160_vm6 = vcmp.gt.f32.partialorder %v1145_v17, 0.0  ;;  %v757_v20 = vunpack.c.l.s4 %v1893_v63 }
 0x3c4   :  { %v1168_v19 = vsel %vm1160_vm6, 1, %v1891_v22 }
 0x3c5   :  { %v1176_v24 = vperm.slane %v1168_v19, 0  ;;  %v2241_v6 = vunpack.c.0.s8 %v757_v20 }
 0x3c7   :  { %vm1184_vm7 = vcmp.eq.s32.totalorder %v1176_v24, 1 }
 0x3e0   :  { %1198 = vmax.xlane.f32.xlu0 %v1197_v7 }
 0x3e8   :  { %1213 = vmax.xlane.f32.xlu0 %v1212_v12 }
 0x3f0   :  { %1219 = vmax.xlane.f32.xlu0 %v1218_v16 }
 0x3ff   :  { %v565_v36 = vpop.f32.mrf.mxu3 }
 0x40a   :  { %v1202_v18 = vpop.xlane.xlu1 %1201 }
 0x40b   :  { %v1222_v21 = vsub.f32 %v1190_v38, %v1202_v18 }
 0x40d   :  { %v1231_v23 = vmul.f32 1.442695, %v1222_v21 }
 0x40f   :  { %1803 = vpow2.f32 %v1231_v23 }
 0x412   :  { %v1205_v25 = vpop.xlane.xlu1 %1204 }
 0x413   :  { %v1223_v15 = vsub.f32 %v1191_v44, %v1205_v25  ;;  %v998_v27 = vpop.trf.xlu0  ;;  %v611_v44 = vpop.f32.mrf.mxu3 }
 0x414   :  { %v2212_v28 = vsel %vm1184_vm7, %v998_v27, -1e+30  ;;  %v729_v1 = vrot.slane %v611_v44, 4 }
 0x415   :  { %v2214_v29 = vpop.eup %1803  ;;  %v1233_v31 = vmul.f32 1.442695, %v1223_v15  ;;  %v1206_v26 = vsel %vm455_vm3, %v2212_v28, -inf }
 0x416   :  { %1207 = vmax.xlane.f32.xlu2 %v1206_v26  ;;  %v1248_v22 = vsel %vm455_vm3, %v2214_v29, 0.0  ;;  %v731_v8 = vsel %vm730_vm8, %v729_v1, %v565_v36 }
 0x417   :  { %1805 = vpow2.f32 %v1233_v31  ;;  %1249 = vadd.xlane.f32.xlu1 %v1248_v22 }
 0x41a   :  { %v1211_v11 = vpop.xlane.xlu1 %1210 }
 0x41b   :  { %v1225_v10 = vsub.f32 %v2182_v53, %v1211_v11  ;;  %v1892_v53 = vmov 1983009808   ;;  %v680_v55 = vpop.f32.mrf.mxu3 }
 0x41c   :  { %v733_v54 = vunpack.c.l.s4 %v1892_v53  ;;  %v749_v57 = vsel %vm730_vm8, %v748_v56, %v680_v55  ;;  %v77_v55 = vld [vmem:[%s2453_s6 + $0x38] sm:$0xff]  ;;  %v76_v56 = vld [vmem:[%s2453_s6 + $0x30] sm:$0xff] }
 0x41d   :  { %v2221_v32 = vpop.eup %1805  ;;  %v1237_v33 = vmul.f32 1.442695, %v1225_v10  ;;  %787 = vmatpush.msrb.mxu3 %v77_v55 }
 0x41e   :  { %v1251_v34 = vsel %vm455_vm3, %v2221_v32, 0.0  ;;  %v2235_v58 = vunpack.c.0.s8 %v733_v54 }
 0x41f   :  { %1807 = vpow2.f32 %v1237_v33  ;;  %1252 = vadd.xlane.f32.xlu1 %v1251_v34  ;;  %788 = vmatpush.msrb.mxu3 %v76_v56 }
 0x420   :  { %v747_v2 = vperm.slane %v743_v62, %v2235_v58  ;;  %v735_v13 = vperm.slane %v731_v8, %v2235_v58 }
 0x425   :  { %v2225_v37 = vpop.eup %1807 }
 0x426   :  { %v1257_v38 = vsel %vm455_vm3, %v2225_v37, 0.0 }
 0x427   :  { %1258 = vadd.xlane.f32.xlu1 %v1257_v38  ;;  %v1217_v40 = vpop.xlane.xlu1 %1216 }
 0x428   :  { %v1227_v41 = vsub.f32 %v2187_v60, %v1217_v40  ;;  %v753_v60 = vperm.slane %v749_v57, %v2235_v58  ;;  %v72_v57 = vld [vmem:[%s2453_s6 + $0x10] sm:$0xff] }
 0x42a   :  { %v1241_v30 = vmul.f32 1.442695, %v1227_v41  ;;  %v760_v0 = vrot.slane %v753_v60, 4  ;;  %v71_v60 = vld [vmem:[%s2453_s6 + $0x8] sm:$0xff] }
 0x42c   :  { %1809 = vpow2.f32 %v1241_v30  ;;  %v761_v7 = vsel %vm730_vm8, %v760_v0, %v747_v2 }
 0x42d   :  { %v765_v12 = vperm.slane %v761_v7, %v2241_v6 }
 0x42f   :  { %v766_v19 = vrot.slane %v765_v12, 4 }
 0x432   :  { %v2230_v46 = vpop.eup %1809 }
 0x433   :  { %v1263_v50 = vsel %vm455_vm3, %v2230_v46, 0.0 }
 0x434   :  { %1264 = vadd.xlane.f32.xlu1 %v1263_v50 }
 0x440   :  { %v634_v3 = vpop.f32.mrf.mxu0 }
 0x441   :  { %v736_v4 = vrot.slane %v634_v3, 4 }
 0x443   :  { %v737_v47 = vsel %vm730_vm8, %v736_v4, %v588_v35 }
 0x444   :  { %v741_v59 = vperm.slane %v737_v47, %v2235_v58 }
 0x446   :  { %v754_v16 = vrot.slane %v741_v59, 4 }
 0x448   :  { %v755_v17 = vsel %vm730_vm8, %v754_v16, %v735_v13 }
 0x449   :  { %v759_v18 = vperm.slane %v755_v17, %v2241_v6 }
 0x44b   :  { %v2252_v21 = vsel %vm730_vm8, %v766_v19, %v759_v18  ;;  %v768_v42 = vrot.slane %v759_v18, 4 }
 0x44d   :  { %v769_v44 = vsel %vm730_vm8, %v765_v12, %v768_v42 }
 0x453   :  { %v1199_v23 = vpop.xlane.xlu0 %1198 }
 0x454   :  { %v1221_v24 = vsub.f32 %v2197_v5, %v1199_v23 }
 0x456   :  { %v1229_v25 = vmul.f32 1.442695, %v1221_v24 }
 0x458   :  { %1811 = vpow2.f32 %v1229_v25  ;;  %v819_v25 = vld [vmem:[%s2455_s8 + $0x30] sm:$0xff] }
 0x45b   :  { %v1214_v15 = vpop.xlane.xlu0 %1213 }
 0x45c   :  { %v1226_v27 = vsub.f32 %v2202_v9, %v1214_v15 }
 0x45e   :  { %v1812_v31 = vpop.eup %1811  ;;  %v1239_v26 = vmul.f32 1.442695, %v1226_v27  ;;  %v818_v27 = vld [vmem:[%s2455_s8 + $0x28] sm:$0xff] }
 0x45f   :  { %v1245_v22 = vsel %vm455_vm3, %v1812_v31, 0.0 }
 0x460   :  { %1813 = vpow2.f32 %v1239_v26  ;;  %1246 = vadd.xlane.f32.xlu0 %v1245_v22  ;;  %v816_v22 = vld [vmem:[%s2455_s8 + $0x18] sm:$0xff] }
 0x463   :  { %v1220_v11 = vpop.xlane.xlu0 %1219 }
 0x464   :  { %v1228_v10 = vsub.f32 %v2206_v14, %v1220_v11  ;;  %v815_v11 = vld [vmem:[%s2455_s8 + $0x10] sm:$0xff] }
 0x466   :  { %v1814_v33 = vpop.eup %1813  ;;  %v1243_v34 = vmul.f32 1.442695, %v1228_v10 }
 0x467   :  { %v1260_v35 = vsel %vm455_vm3, %v1814_v33, 0.0 }
 0x468   :  { %1815 = vpow2.f32 %v1243_v34  ;;  %1261 = vadd.xlane.f32.xlu2 %v1260_v35 }
 0x46e   :  { %v2259_v5 = vpop.eup %1815 }
 0x46f   :  { %v1266_v9 = vsel %vm455_vm3, %v2259_v5, 0.0 }
 0x470   :  { %1267 = vadd.xlane.f32.xlu2 %v1266_v9 }
 0x489   :  { %v1208_v36 = vpop.xlane.xlu2 %1207 }
 0x48a   :  { %v1224_v38 = vsub.f32 %v2212_v28, %v1208_v36  ;;  %v1250_v48 = vpop.xlane.xlu1 %1249 }
 0x48c   :  { %v1235_v40 = vmul.f32 1.442695, %v1224_v38 }
 0x48e   :  { %1817 = vpow2.f32 %v1235_v40 }
 0x492   :  { %v1253_v3 = vpop.xlane.xlu1 %1252 }
 0x494   :  { %v1818_v41 = vpop.eup %1817 }
 0x495   :  { %v1254_v14 = vsel %vm455_vm3, %v1818_v41, 0.0  ;;  %vm775_vm3 = vcmask 523264  }
 0x496   :  { %1255 = vadd.xlane.f32.xlu0 %v1254_v14 }
 0x49a   :  { %v1259_v47 = vpop.xlane.xlu1 %1258 }
 0x4a7   :  { %v1265_v13 = vpop.xlane.xlu1 %1264 }
 0x4aa   :  { %771 = vrot.lane.b32.xlu0 %v769_v44, %s1894_s3 }
 0x4d3   :  { %v1247_v30 = vpop.xlane.xlu0 %1246 }
 0x4d4   :  { %1819 = vrcp.f32 %v1247_v30 }
 0x4d5   :  { %1821 = vrcp.f32 %v1250_v48 }
 0x4da   :  { %v1820_v50 = vpop.eup %1819 }
 0x4db   :  { %v1277_v53 = vmul.f32 %v1820_v50, %v1812_v31  ;;  %v1822_v28 = vpop.eup %1821  ;;  %v1262_v63 = vpop.xlane.xlu2 %1261  ;;  %v817_v31 = vld [vmem:[%s2455_s8 + $0x20] sm:$0xff] }
 0x4dc   :  { %v1278_v54 = vmul.f32 %v1822_v28, %v2214_v29  ;;  %v74_v29 = vld [vmem:[%s2453_s6 + $0x20] sm:$0xff] }
 0x4dd   :  { %1749 = vmatmul.msk.f32.vlgmr.msrb.gmra.mxu2 %vm544_vm14, %v1277_v53 }
 0x4de   :  { %1372 = vmatpush.msrb.mxu2 %v2116_v43  ;;  %v75_v43 = vld [vmem:[%s2453_s6 + $0x28] sm:$0xff] }
 0x4df   :  { %789 = vmatpush.msrb.mxu3 %v75_v43 }
 0x4e1   :  { %790 = vmatpush.msrb.mxu3 %v74_v29 }
 0x4e3   :  { %v1268_v1 = vpop.xlane.xlu2 %1267 }
 0x4e5   :  { %1750 = vmatmul.msk.f32.vlgmr.msra.gmra.mxu2 %vm544_vm14, %v1278_v54 }
 0x4e6   :  { %1418 = vmatpush.msra.mxu2 %v2134_v49  ;;  %v73_v49 = vld [vmem:[%s2453_s6 + $0x18] sm:$0xff] }
 0x4e7   :  { %791 = vmatpush.msrb.mxu3 %v73_v49 }
 0x4e9   :  { %792 = vmatpush.msrb.mxu3 %v72_v57 }
 0x4eb   :  { %793 = vmatpush.msrb.mxu3 %v71_v60 }
 0x4ed   :  { %794 = vmatpush.msrb.mxu3 %v70_v61  ;;  %v813_v61 = vld [vmem:[%s2455_s8] sm:$0xff] }
 0x4ef   :  { %1349 = vmatpush.msra.mxu3 %v2107_v39 }
 0x509   :  { %v1256_v62 = vpop.xlane.xlu0 %1255 }
 0x50a   :  { %1823 = vrcp.f32 %v1256_v62 }
 0x50b   :  { %1825 = vrcp.f32 %v1262_v63  ;;  %v1542_v63 = vld [vmem:[%s2457_s10] sm:$0xff] }
 0x50c   :  { %1827 = vrcp.f32 %v1268_v1  ;;  %v1538_v1 = vld [vmem:[%s2451_s4] sm:$0xff] }
 0x50d   :  { %1829 = vrcp.f32 %v1253_v3 }
 0x50e   :  { %1831 = vrcp.f32 %v1259_v47 }
 0x50f   :  { %1833 = vrcp.f32 %v1265_v13 }
 0x510   :  { %v1824_v20 = vpop.eup %1823 }
 0x511   :  { %v1280_v0 = vmul.f32 %v1824_v20, %v1818_v41  ;;  %v1826_v2 = vpop.eup %1825  ;;  %v1600_v20 = vld [vmem:[%s2459_s12 + $0x18] sm:$0xff] }
 0x512   :  { %v1282_v4 = vmul.f32 %v1826_v2, %v1814_v33  ;;  %v1828_v8 = vpop.eup %1827  ;;  %v814_v33 = vld [vmem:[%s2455_s8 + $0x8] sm:$0xff] }
 0x513   :  { %1752 = vmatmul.msk.f32.vlgmr.msrb.gmra.mxu2 %vm544_vm14, %v1280_v0  ;;  %v1284_v59 = vmul.f32 %v1828_v8, %v2259_v5  ;;  %v1768_v8 = vld [vmem:[%s2458_s11] ss:$0 sm:$0xff] }
 0x514   :  { %1464 = vmatpush.msrb.mxu2 %v2149_v52  ;;  %v1830_v52 = vpop.eup %1829 }
 0x515   :  { %v1279_v12 = vmul.f32 %v1830_v52, %v2221_v32  ;;  %v1832_v16 = vpop.eup %1831  ;;  %v1541_v32 = vld [vmem:[%s2456_s9 + $0x8] sm:$0xff] }
 0x516   :  { %v1281_v17 = vmul.f32 %v1832_v16, %v2225_v37  ;;  %1585 = vmatpush.msra.mxu0 %v1541_v32  ;;  %v1769_v16 = vld [vmem:[%s2460_s13] ss:$0 sm:$0xff]  ;;  %v1665_v32 = vld [vmem:[%s2461_s14 + $0x70] sm:$0xff]  ;;  %s1710_s13 = sshll.u32 %s2464_s17, 4  ;;  %s1711_s13 = int_to_ptr.hbm [resolvable:$true] %s1710_s13 }
 0x51b   :  { %1754 = vmatmul.msk.f32.vlgmr.msra.gmra.mxu2 %vm544_vm14, %v1282_v4  ;;  %v1599_v4 = vld [vmem:[%s2459_s12 + $0x10] sm:$0xff] }
 0x51c   :  { %v772_v39 = vpop.permute.xlu0 %771 }
 0x51d   :  { %v774_v7 = vsel %vm78_vm0, %v2252_v21, %v772_v39  ;;  %v1598_v39 = vld [vmem:[%s2459_s12 + $0x8] sm:$0xff] }
 0x51e   :  { %1740 = vmatmul.msk.f32.vlgmr.msrb.gmra.mxu3 %vm775_vm3, %v774_v7  ;;  %v1597_v7 = vld [vmem:[%s2459_s12] sm:$0xff] }
 0x51f   :  { %1395 = vmatpush.msrb.mxu3 %v2127_v45  ;;  %v1834_v45 = vpop.eup %1833 }
 0x520   :  { %v1283_v18 = vmul.f32 %v1834_v45, %v2230_v46  ;;  %v820_v46 = vld [vmem:[%s2455_s8 + $0x38] sm:$0xff]  ;;  %s1699_s8 = sshll.u32 %s2463_s16, 4  ;;  %s1700_s8 = int_to_ptr.hbm [resolvable:$true] %s1699_s8 }
 0x523   :  { %1756 = vmatmul.msk.f32.vlgmr.msrb.gmra.mxu2 %vm544_vm14, %v1284_v59 }
 0x526   :  { %1751 = vmatmul.msk.f32.vlgmr.msra.gmra.mxu3 %vm544_vm14, %v1279_v12 }
 0x527   :  { %1441 = vmatpush.msra.mxu3 %v2142_v51  ;;  %v1540_v51 = vld [vmem:[%s2456_s9] sm:$0xff] }
 0x528   :  { %1586 = vmatpush.msra.mxu0 %v1540_v51  ;;  %v1664_v51 = vld [vmem:[%s2461_s14 + $0x68] sm:$0xff] }
 0x52e   :  { %1753 = vmatmul.msk.f32.vlgmr.msrb.gmra.mxu3 %vm544_vm14, %v1281_v17 }
 0x52f   :  { %1525 = vmatpush.msrb.mxu3 %v820_v46  ;;  %v1658_v46 = vld [vmem:[%s2461_s14 + $0x38] sm:$0xff] }
 0x531   :  { %1526 = vmatpush.msrb.mxu3 %v819_v25  ;;  %v1657_v25 = vld [vmem:[%s2461_s14 + $0x30] sm:$0xff] }
 0x533   :  { %1527 = vmatpush.msrb.mxu3 %v818_v27 }
 0x535   :  { %1528 = vmatpush.msrb.mxu3 %v817_v31  ;;  %v1655_v31 = vld [vmem:[%s2461_s14 + $0x20] sm:$0xff] }
 0x536   :  { %1755 = vmatmul.msk.f32.vlgmr.msra.gmra.mxu3 %vm544_vm14, %v1283_v18  ;;  %v1666_v18 = vld [vmem:[%s2461_s14 + $0x78] sm:$0xff] }
 0x537   :  { %1529 = vmatpush.msrb.mxu3 %v816_v22  ;;  %1671 = vmatpush.msra.mxu1 %v1666_v18 }
 0x539   :  { %1530 = vmatpush.msrb.mxu3 %v815_v11  ;;  %1672 = vmatpush.msra.mxu1 %v1665_v32 }
 0x53b   :  { %1531 = vmatpush.msrb.mxu3 %v814_v33  ;;  %1673 = vmatpush.msra.mxu1 %v1664_v51  ;;  %v1653_v33 = vld [vmem:[%s2461_s14 + $0x10] sm:$0xff] }
 0x53d   :  { %1532 = vmatpush.msrb.mxu3 %v813_v61 }
 0x560   :  { %v1305_v19 = vpop.f32.mrf.mxu2 }
 0x568   :  { %v1328_v21 = vpop.f32.mrf.mxu2 }
 0x596   :  { %v1374_v37 = vpop.f32.mrf.mxu2 }
 0x597   :  { %v1475_v10 = vrot.slane %v1374_v37, 4  ;;  %v1661_v37 = vld [vmem:[%s2461_s14 + $0x50] sm:$0xff] }
 0x599   :  { %v1476_v5 = vsel %vm730_vm8, %v1475_v10, %v1328_v21  ;;  %v1662_v21 = vld [vmem:[%s2461_s14 + $0x58] sm:$0xff] }
 0x59a   :  { %v1480_v40 = vperm.slane %v1476_v5, %v2235_v58  ;;  %v1654_v10 = vld [vmem:[%s2461_s14 + $0x18] sm:$0xff] }
 0x59c   :  { %v1493_v42 = vrot.slane %v1480_v40, 4 }
 0x59e   :  { %v1420_v15 = vpop.f32.mrf.mxu2 }
 0x5a1   :  { %v796_v23 = vpop.f32.mrf.mxu3 }
 0x5a2   :  { %v799_v24 = vmax.f32 %v796_v23, 0.0  ;;  %v1660_v23 = vld [vmem:[%s2461_s14 + $0x48] sm:$0xff] }
 0x5a4   :  { %1759 = vmatmul.msk.f32.vlgmr.msra.gmra.mxu0 %vm1544_vm9, %v799_v24  ;;  %v1659_v24 = vld [vmem:[%s2461_s14 + $0x40] sm:$0xff] }
 0x5a6   :  { %v1466_v35 = vpop.f32.mrf.mxu2 }
 0x5a7   :  { %v1487_v36 = vrot.slane %v1466_v35, 4  ;;  %v1651_v35 = vld [vmem:[%s2461_s14] sm:$0xff] }
 0x5a9   :  { %v1351_v26 = vpop.f32.mrf.mxu3  ;;  %v1488_v14 = vsel %vm730_vm8, %v1487_v36, %v1420_v15  ;;  %v1656_v15 = vld [vmem:[%s2461_s14 + $0x28] sm:$0xff] }
 0x5aa   :  { %v1469_v34 = vrot.slane %v1351_v26, 4  ;;  %v1492_v44 = vperm.slane %v1488_v14, %v2235_v58 }
 0x5ac   :  { %v1470_v38 = vsel %vm730_vm8, %v1469_v34, %v1305_v19  ;;  %v1499_v54 = vrot.slane %v1492_v44, 4  ;;  %v1663_v19 = vld [vmem:[%s2461_s14 + $0x60] sm:$0xff]  ;;  %v1652_v34 = vld [vmem:[%s2461_s14 + $0x8] sm:$0xff]  ;;  %s1895_s14 = smov [#allocation4]  }
 0x5ad   :  { %v1474_v41 = vperm.slane %v1470_v38, %v2235_v58  ;;  %1674 = vmatpush.msra.mxu1 %v1663_v19  ;;  %s1708_s25 = sshll.u32 %s1895_s14, 4  ;;  %s1709_s25 = int_to_ptr.vmem [resolvable:$true] %s1708_s25 }
 0x5af   :  { %v1494_v48 = vsel %vm730_vm8, %v1493_v42, %v1474_v41  ;;  %1675 = vmatpush.msra.mxu1 %v1662_v21 }
 0x5b0   :  { %v1498_v28 = vperm.slane %v1494_v48, %v2241_v6 }
 0x5b1   :  { %v1397_v9 = vpop.f32.mrf.mxu3  ;;  %1676 = vmatpush.msra.mxu1 %v1661_v37 }
 0x5b2   :  { %v1507_v29 = vrot.slane %v1498_v28, 4 }
 0x5b3   :  { %1677 = vmatpush.msra.mxu1 %v1660_v23 }
 0x5b5   :  { %1678 = vmatpush.msra.mxu1 %v1659_v24 }
 0x5b7   :  { %1679 = vmatpush.msra.mxu1 %v1658_v46 }
 0x5b9   :  { %v1443_v30 = vpop.f32.mrf.mxu3  ;;  %1680 = vmatpush.msra.mxu1 %v1657_v25 }
 0x5ba   :  { %v1481_v50 = vrot.slane %v1443_v30, 4 }
 0x5bb   :  { %1681 = vmatpush.msra.mxu1 %v1656_v15 }
 0x5bc   :  { %v1482_v53 = vsel %vm730_vm8, %v1481_v50, %v1397_v9 }
 0x5bd   :  { %v1486_v55 = vperm.slane %v1482_v53, %v2235_v58  ;;  %v1543_v58 = vld [vmem:[%s2457_s10 + $0x8] sm:$0xff]  ;;  %1682 = vmatpush.msra.mxu1 %v1655_v31  ;;  %v1770_v53 = vld [vmem:[%s2462_s15] ss:$0 sm:$0xff] }
 0x5be   :  { %1562 = vmatpush.msra.mxu2 %v1543_v58 }
 0x5bf   :  { %v1500_v56 = vsel %vm730_vm8, %v1499_v54, %v1486_v55  ;;  %1683 = vmatpush.msra.mxu1 %v1654_v10 }
 0x5c0   :  { %v1504_v43 = vperm.slane %v1500_v56, %v2241_v6  ;;  %1563 = vmatpush.msra.mxu2 %v1542_v63 }
 0x5c1   :  { %1684 = vmatpush.msra.mxu1 %v1653_v33 }
 0x5c2   :  { %v1508_v49 = vsel %vm730_vm8, %v1504_v43, %v1507_v29  ;;  %v1505_v57 = vrot.slane %v1504_v43, 4  ;;  %1620 = vmatpush.msrb.mxu2 %v1600_v20 }
 0x5c3   :  { %1510 = vrot.lane.b32.xlu2 %v1508_v49, %s1894_s3  ;;  %1685 = vmatpush.msra.mxu1 %v1652_v34 }
 0x5c4   :  { %v1506_v60 = vsel %vm730_vm8, %v1505_v57, %v1498_v28  ;;  %1621 = vmatpush.msrb.mxu2 %v1599_v4 }
 0x5c5   :  { %1686 = vmatpush.msra.mxu1 %v1651_v35 }
 0x5c6   :  { %1622 = vmatpush.msrb.mxu2 %v1598_v39 }
 0x5c8   :  { %1623 = vmatpush.msrb.mxu2 %v1597_v7 }
 0x61d   :  { %v1511_v62 = vpop.permute.xlu2 %1510 }
 0x61e   :  { %v1513_v6 = vsel %vm78_vm0, %v1506_v60, %v1511_v62 }
 0x61f   :  { %1757 = vmatmul.msk.f32.vlgmr.msrb.gmra.mxu3 %vm775_vm3, %v1513_v6 }
 0x621   :  { %v1588_v47 = vpop.f32.mrf.mxu0 }
 0x6a2   :  { %v1534_v0 = vpop.f32.mrf.mxu3 }
 0x6a3   :  { %v1537_v2 = vmax.f32 %v1534_v0, 0.0 }
 0x6a5   :  { %v1539_v3 = vadd.f32 %v1538_v1, %v1537_v2 }
 0x6a7   :  { %1758 = vmatmul.msk.f32.vlgmr.msra.gmra.mxu2 %vm1544_vm9, %v1539_v3 }
 0x72a   :  { %v1565_v52 = vpop.f32.mrf.mxu2 }
 0x72b   :  { %v1589_v59 = vadd.f32 %v1588_v47, %v1565_v52 }
 0x72d   :  { %v1595_v12 = vadd.f32 %v1768_v8, %v1589_v59 }
 0x72f   :  { %v1596_v13 = vmax.f32 %v1595_v12, 0.0 }
 0x731   :  { %1760 = vmatmul.msk.f32.vlgmr.msrb.gmra.mxu2 %vm78_vm0, %v1596_v13 }
 0x7b4   :  { %v1625_v17 = vpop.f32.mrf.mxu2 }
 0x7b5   :  { %v1626_v45 = vadd.f32 %v1769_v16, %v1625_v17 }
 0x7b7   :  { %1628 = vmax.xlane.f32.xlu1 %v1626_v45 }
 0x82a   :  { %v1629_v27 = vpop.xlane.xlu1 %1628 }
 0x82b   :  { %v1630_v26 = vsub.f32 %v1626_v45, %v1629_v27 }
 0x82d   :  { %v1631_v22 = vmul.f32 1.442695, %v1630_v26 }
 0x82f   :  { %1835 = vpow2.f32 %v1631_v22 }
 0x835   :  { %v1836_v11 = vpop.eup %1835 }
 0x836   :  { %1633 = vadd.xlane.f32.xlu0 %v1836_v11 }
 0x8a9   :  { %v1634_v5 = vpop.xlane.xlu0 %1633 }
 0x8aa   :  { %1837 = vrcp.f32 %v1634_v5  ;;  %v1646_v40 = vand.u32 2147483648, %v1634_v5  ;;  %v1644_v14 = vand.u32 2147483647, %v1634_v5  ;;  %vm1640_vm14 = vweird.f32 %v1634_v5 }
 0x8ac   :  { %v1647_v44 = vor.u32 1.1754944e-38, %v1646_v40  ;;  %vm1645_vm11 = vcmp.eq.f32.partialorder %v1644_v14, 8.507059e+37 }
 0x8b0   :  { %v1838_v9 = vpop.eup %1837 }
 0x8b1   :  { %v1636_v36 = vmul.f32 %v1838_v9, %v1634_v5  ;;  %vm1641_vm0 = vweird.f32 %v1838_v9 }
 0x8b2   :  { %vm1642_vm10 = vmor %vm1640_vm14, %vm1641_vm0 }
 0x8b3   :  { %v1637_v38 = vsub.f32 1.0, %v1636_v36 }
 0x8b5   :  { %v1638_v41 = vmul.f32 %v1838_v9, %v1637_v38 }
 0x8b7   :  { %v1639_v42 = vadd.f32 %v1838_v9, %v1638_v41 }
 0x8b9   :  { %v1643_v30 = vsel %vm1642_vm10, %v1838_v9, %v1639_v42 }
 0x8ba   :  { %v1648_v48 = vsel %vm1645_vm11, %v1647_v44, %v1643_v30 }
 0x8bb   :  { %v1649_v50 = vmul.f32 %v1836_v11, %v1648_v48 }
 0x8bd   :  { %1687 = vmatmul.f32.vlgmr.msra.gmra.mxu1 %v1649_v50  ;;  %1650 = vst [vmem:[#allocation4] sm:$0xff] %v1649_v50 }
 0x8be   :  { %1713 = dma.vmem_to_hbm [thread:$0]  %s1709_s25, 128, %s1711_s13, [#allocation5]  }
 0x93a   :  { %v1688_v28 = vpop.f32.mrf.mxu1 }
 0x93b   :  { %v1689_v54 = vadd.f32 %v1770_v53, %v1688_v28 }
 0x93d   :  { %1691 = vst [vmem:[#allocation2] sm:$0xff] %v1689_v54 }
 0x93e   :  { %1702 = dma.vmem_to_hbm [thread:$0]  %s1698_s29, 128, %s1700_s8, [#allocation3]  }
 0x93f   :  { %1887 = dma.done.wait [#allocation3], 128  }
 0x940   :  { %1888 = vsyncadd [#allocation3], 4294967168 }
 0x941   :  { %1889 = dma.done.wait [#allocation5], 128  }
 0x942   :  { %1890 = vsyncadd [#allocation5], 4294967168 }
 0x943   :  { %1722 = vsyncpa [#allocation3], 1 }
 0x944   :  { %1723 = vsyncpa [#allocation5], 1 }

</bundles_post_ra>
